<compile_context>
chip_gen: v6e
topology: v6e:2x2x1
jax: 0.10.0
libtpu: 0.0.40
codegen_flags: <defaults>
</compile_context>

<pallas_src>
import functools
import math

import jax
import jax.numpy as jnp
from jax.experimental import pallas as pl
from jax.experimental.pallas import tpu as pltpu


def _spd_transform_kernel(w_ref, wt_ref, x_ref, o_ref, *, bc, n, m,
                          compute_dtype):
    """One grid step: transform a tile of `bt` SPD matrices.

    w_ref  : (N, M)       weight, resident in VMEM across all grid steps
    wt_ref : (M, N)       weight^T, precomputed host-side (no per-step w.T)
    x_ref  : (bt*N, N)    tile of inputs, batch folded into the sublane dim
    o_ref  : (M, bt*M)    lane-dense transposed output slab:
                          o_ref[j, b*M + i] == (W^T X_b W)[i, j]
    """
    w = w_ref[...]        # (N, M)
    w_t = wt_ref[...]     # (M, N)

    bt_rows = x_ref.shape[0]          # bt * N (static)
    n_chunks = bt_rows // (bc * n)

    # Statically unrolled chunk loop (n_chunks is a small Python int); each
    # iteration ends in a store, so live ranges stay bounded.
    for c in range(n_chunks):
        # ---- first contraction: one big MXU pass over the whole chunk ----
        xb = x_ref[pl.ds(c * bc * n, bc * n), :]              # (bc*N, N)
        if compute_dtype is not None:
            xb = xb.astype(compute_dtype)                     # hoisted cast
        xw = jnp.dot(xb, w, preferred_element_type=jnp.float32)  # (bc*N, M)
        if compute_dtype is not None:
            xw = xw.astype(compute_dtype)

        # ---- second contraction: W^T @ (X_b W) per element, exact, no
        #      transposed MXU operands (W^T is already materialized) --------
        outs = [
            jnp.dot(w_t, xw[b * n:(b + 1) * n, :],
                    preferred_element_type=jnp.float32)       # (M, M)
            for b in range(bc)
        ]

        # ---- lane-dense store: row-stack (cheap, sublane concat) then one
        #      2-D XLU transpose -> (M, bc*M) slab, bc*M lanes wide ----------
        slab = jnp.concatenate(outs, axis=0)                  # (bc*M, M)
        o_ref[:, pl.ds(c * bc * m, bc * m)] = slab.T.astype(o_ref.dtype)


def _choose_block_b(batch, n, m, *, target_block_bytes=2 * 1024 * 1024):
    """Per-grid-step batch tile: amortize grid overhead, stay inside VMEM.

    Budget is conservative so the double-buffered X tile (+ out tile + W)
    stays well under the scoped VMEM limit on every generation, including
    v7x's 64 MiB physical / 32 MiB scoped.
    """
    bytes_per_elt = 4 * (n * n + m * m)
    bt = max(1, target_block_bytes // bytes_per_elt)
    bt = min(bt, 128)                      # bound per-step unroll / code size
    if batch >= 2:
        # keep >= 2 grid steps so both v7x TensorCores get work
        bt = min(bt, -(-batch // 2))
    return int(max(1, bt))


def spd_transform(x, weight, *, block_b=None, compute_dtype=None):
    """Compute weight^T @ x @ weight for a batch of SPD matrices.

    x:       (B, N, N) float32
    weight:  (N, M)    float32 (orthonormal columns, Stiefel point)
    returns  (B, M, M) in x.dtype.
    compute_dtype: optional MXU operand dtype (e.g. jnp.bfloat16 on v6e/v7x);
                   accumulation stays float32.
    """
    B, N, N2 = x.shape
    if N != N2:
        raise ValueError("input must be a batch of square matrices")
    Nw, M = weight.shape
    if Nw != N:
        raise ValueError("weight first dim must match input size")

    # --- batch tile size ---------------------------------------------------
    bt = block_b if block_b is not None else _choose_block_b(B, N, M)
    # output block minor dim is bt*M: keep it a multiple of 128 (lane-dense)
    align = 128 // math.gcd(M, 128)
    bt = max(align, (bt // align) * align)
    # inner chunk bounds vreg pressure of the (bc*N, M) intermediate
    bc = max(1, min(8, 1024 // max(N, 1)))
    bc = max(1, math.gcd(bt, bc))

    n_steps = -(-B // bt)
    b_pad = n_steps * bt

    x_in = x if b_pad == B else jnp.pad(x, ((0, b_pad - B), (0, 0), (0, 0)))
    # Fold batch into rows for the first matmul. This reshape is layout
    # compatible with the (B, N, N) tiling (free / bitcast for N % 8 == 0).
    x2 = x_in.reshape(b_pad * N, N)

    w = weight
    w_t = weight.T                      # one-time transpose, outside the kernel
    if compute_dtype is not None:
        w = w.astype(compute_dtype)
        w_t = w_t.astype(compute_dtype)

    kernel = functools.partial(_spd_transform_kernel, bc=bc, n=N, m=M,
                               compute_dtype=compute_dtype)

    out_t = pl.pallas_call(
        kernel,
        out_shape=jax.ShapeDtypeStruct((M, b_pad * M), x.dtype),
        grid_spec=pltpu.PrefetchScalarGridSpec(
            num_scalar_prefetch=0,
            grid=(n_steps,),
            in_specs=[
                pl.BlockSpec((N, M), lambda i: (0, 0)),          # W (resident)
                pl.BlockSpec((M, N), lambda i: (0, 0)),          # W^T (resident)
                pl.BlockSpec((bt * N, N), lambda i: (i, 0)),     # batch tile
            ],
            out_specs=pl.BlockSpec((M, bt * M), lambda i: (0, i)),
        ),
        compiler_params=pltpu.CompilerParams(
            dimension_semantics=("parallel",),
        ),
    )(w, w_t, x2)

    # (M, b_pad*M) -> (b_pad, M, M): layout plumbing in the wrapper.
    out = jnp.transpose(out_t.reshape(M, b_pad, M), (1, 2, 0))
    return out[:B] if b_pad != B else out


def make_orthogonal_weight(key, input_size, output_size, dtype=jnp.float32):
    """Deterministic equivalent of nn.init.orthogonal_ on an (N, M) tensor."""
    a = jax.random.normal(key, (input_size, output_size), dtype=jnp.float32)
    q, r = jnp.linalg.qr(a)
    d = jnp.sign(jnp.diagonal(r))
    d = jnp.where(d == 0, 1.0, d)
    q = q * d[None, :]
    return q.astype(dtype)


if __name__ == "__main__":
    key = jax.random.PRNGKey(0)
    k_w, k_x = jax.random.split(key)

    # Small but batching-relevant shapes: 64 SPD matrices of size 32x32 -> 16x16
    B, N, M = 64, 32, 16

    # Batch of SPD inputs: X = A A^T + eps * I
    a = jax.random.normal(k_x, (B, N, N), dtype=jnp.float32)
    x = jnp.einsum("bij,bkj->bik", a, a) + 1e-3 * jnp.eye(N, dtype=jnp.float32)

    # Orthogonal (Stiefel) weight, deterministic init
    w = make_orthogonal_weight(k_w, N, M)

    out = spd_transform(x, w)
    out = jax.block_until_ready(out)

    # Reference check in plain JAX
    ref = jnp.einsum("nm,bnk,kp->bmp", w, x, w)
    assert out.shape == (B, M, M)
    assert jnp.allclose(out, ref, atol=1e-3, rtol=1e-3), float(
        jnp.max(jnp.abs(out - ref)))

    print("KERNEL_OK")
</pallas_src>

<mosaic_0001>
module attributes {stable_mosaic.version = 11 : i64} {
  func.func @_spd_transform_kernel(%arg0: i32, %arg1: memref<32x16xf32, #tpu.memory_space<vmem>>, %arg2: memref<16x32xf32, #tpu.memory_space<vmem>>, %arg3: memref<1024x32xf32, #tpu.memory_space<vmem>>, %arg4: memref<16x512xf32, #tpu.memory_space<vmem>>) attributes {dimension_semantics = [#tpu.dimension_semantics<parallel>], iteration_bounds = array<i64: 2>, scalar_prefetch = 0 : i64, scratch_operands = 0 : i64, tpu.core_type = #tpu.core_type<tc>, window_params = [{pipeline_mode = #tpu.pipeline_mode<synchronous>, transform_indices = @transform_0, window_bounds = array<i64: 32, 16>}, {pipeline_mode = #tpu.pipeline_mode<synchronous>, transform_indices = @transform_1, window_bounds = array<i64: 16, 32>}, {transform_indices = @transform_2, window_bounds = array<i64: 1024, 32>}, {transform_indices = @transform_3, window_bounds = array<i64: 16, 512>}]} {
    %c0 = arith.constant 0 : index
    %c0_0 = arith.constant 0 : index
    %0 = vector.load %arg1[%c0, %c0_0] : memref<32x16xf32, #tpu.memory_space<vmem>>, vector<32x16xf32>
    %c0_1 = arith.constant 0 : index
    %c0_2 = arith.constant 0 : index
    %1 = vector.load %arg2[%c0_1, %c0_2] : memref<16x32xf32, #tpu.memory_space<vmem>>, vector<16x32xf32>
    %c0_3 = arith.constant 0 : index
    %c0_4 = arith.constant 0 : index
    %2 = vector.load %arg3[%c0_3, %c0_4] : memref<1024x32xf32, #tpu.memory_space<vmem>>, vector<256x32xf32>
    %cst = arith.constant dense<0.000000e+00> : vector<256x16xf32>
    %3 = tpu.matmul %2, %0, %cst {dimension_numbers = #tpu.dot_dimension_numbers<[1], [0], [0], [1], [0, 0, 1, 1], [], []>} : vector<256x32xf32>, vector<32x16xf32>, vector<256x16xf32> -> vector<256x16xf32>
    %4 = vector.extract_strided_slice %3 {offsets = [0, 0], sizes = [32, 16], strides = [1, 1]} : vector<256x16xf32> to vector<32x16xf32>
    %cst_5 = arith.constant dense<0.000000e+00> : vector<16x16xf32>
    %5 = tpu.matmul %1, %4, %cst_5 {dimension_numbers = #tpu.dot_dimension_numbers<[1], [0], [0], [1], [0, 0, 1, 1], [], []>} : vector<16x32xf32>, vector<32x16xf32>, vector<16x16xf32> -> vector<16x16xf32>
    %6 = vector.extract_strided_slice %3 {offsets = [32, 0], sizes = [32, 16], strides = [1, 1]} : vector<256x16xf32> to vector<32x16xf32>
    %cst_6 = arith.constant dense<0.000000e+00> : vector<16x16xf32>
    %7 = tpu.matmul %1, %6, %cst_6 {dimension_numbers = #tpu.dot_dimension_numbers<[1], [0], [0], [1], [0, 0, 1, 1], [], []>} : vector<16x32xf32>, vector<32x16xf32>, vector<16x16xf32> -> vector<16x16xf32>
    %8 = vector.extract_strided_slice %3 {offsets = [64, 0], sizes = [32, 16], strides = [1, 1]} : vector<256x16xf32> to vector<32x16xf32>
    %cst_7 = arith.constant dense<0.000000e+00> : vector<16x16xf32>
    %9 = tpu.matmul %1, %8, %cst_7 {dimension_numbers = #tpu.dot_dimension_numbers<[1], [0], [0], [1], [0, 0, 1, 1], [], []>} : vector<16x32xf32>, vector<32x16xf32>, vector<16x16xf32> -> vector<16x16xf32>
    %10 = vector.extract_strided_slice %3 {offsets = [96, 0], sizes = [32, 16], strides = [1, 1]} : vector<256x16xf32> to vector<32x16xf32>
    %cst_8 = arith.constant dense<0.000000e+00> : vector<16x16xf32>
    %11 = tpu.matmul %1, %10, %cst_8 {dimension_numbers = #tpu.dot_dimension_numbers<[1], [0], [0], [1], [0, 0, 1, 1], [], []>} : vector<16x32xf32>, vector<32x16xf32>, vector<16x16xf32> -> vector<16x16xf32>
    %12 = vector.extract_strided_slice %3 {offsets = [128, 0], sizes = [32, 16], strides = [1, 1]} : vector<256x16xf32> to vector<32x16xf32>
    %cst_9 = arith.constant dense<0.000000e+00> : vector<16x16xf32>
    %13 = tpu.matmul %1, %12, %cst_9 {dimension_numbers = #tpu.dot_dimension_numbers<[1], [0], [0], [1], [0, 0, 1, 1], [], []>} : vector<16x32xf32>, vector<32x16xf32>, vector<16x16xf32> -> vector<16x16xf32>
    %14 = vector.extract_strided_slice %3 {offsets = [160, 0], sizes = [32, 16], strides = [1, 1]} : vector<256x16xf32> to vector<32x16xf32>
    %cst_10 = arith.constant dense<0.000000e+00> : vector<16x16xf32>
    %15 = tpu.matmul %1, %14, %cst_10 {dimension_numbers = #tpu.dot_dimension_numbers<[1], [0], [0], [1], [0, 0, 1, 1], [], []>} : vector<16x32xf32>, vector<32x16xf32>, vector<16x16xf32> -> vector<16x16xf32>
    %16 = vector.extract_strided_slice %3 {offsets = [192, 0], sizes = [32, 16], strides = [1, 1]} : vector<256x16xf32> to vector<32x16xf32>
    %cst_11 = arith.constant dense<0.000000e+00> : vector<16x16xf32>
    %17 = tpu.matmul %1, %16, %cst_11 {dimension_numbers = #tpu.dot_dimension_numbers<[1], [0], [0], [1], [0, 0, 1, 1], [], []>} : vector<16x32xf32>, vector<32x16xf32>, vector<16x16xf32> -> vector<16x16xf32>
    %18 = vector.extract_strided_slice %3 {offsets = [224, 0], sizes = [32, 16], strides = [1, 1]} : vector<256x16xf32> to vector<32x16xf32>
    %cst_12 = arith.constant dense<0.000000e+00> : vector<16x16xf32>
    %19 = tpu.matmul %1, %18, %cst_12 {dimension_numbers = #tpu.dot_dimension_numbers<[1], [0], [0], [1], [0, 0, 1, 1], [], []>} : vector<16x32xf32>, vector<32x16xf32>, vector<16x16xf32> -> vector<16x16xf32>
    %20 = tpu.concatenate %5, %7, %9, %11, %13, %15, %17, %19 in 0 : vector<16x16xf32>, vector<16x16xf32>, vector<16x16xf32>, vector<16x16xf32>, vector<16x16xf32>, vector<16x16xf32>, vector<16x16xf32>, vector<16x16xf32> -> vector<128x16xf32>
    %21 = tpu.transpose %20, [1, 0] : vector<128x16xf32> -> vector<16x128xf32>
    %c0_13 = arith.constant 0 : index
    %c0_14 = arith.constant 0 : index
    %22 = vector.load %arg4[%c0_13, %c0_14] : memref<16x512xf32, #tpu.memory_space<vmem>>, vector<16x128xf32>
    tpu.vector_store %arg4[%c0_13, %c0_14], %21 {strides = array<i32>} : memref<16x512xf32, #tpu.memory_space<vmem>>, vector<16x128xf32>,
    %c256 = arith.constant 256 : index
    %c0_15 = arith.constant 0 : index
    %23 = vector.load %arg3[%c256, %c0_15] : memref<1024x32xf32, #tpu.memory_space<vmem>>, vector<256x32xf32>
    %cst_16 = arith.constant dense<0.000000e+00> : vector<256x16xf32>
    %24 = tpu.matmul %23, %0, %cst_16 {dimension_numbers = #tpu.dot_dimension_numbers<[1], [0], [0], [1], [0, 0, 1, 1], [], []>} : vector<256x32xf32>, vector<32x16xf32>, vector<256x16xf32> -> vector<256x16xf32>
    %25 = vector.extract_strided_slice %24 {offsets = [0, 0], sizes = [32, 16], strides = [1, 1]} : vector<256x16xf32> to vector<32x16xf32>
    %cst_17 = arith.constant dense<0.000000e+00> : vector<16x16xf32>
    %26 = tpu.matmul %1, %25, %cst_17 {dimension_numbers = #tpu.dot_dimension_numbers<[1], [0], [0], [1], [0, 0, 1, 1], [], []>} : vector<16x32xf32>, vector<32x16xf32>, vector<16x16xf32> -> vector<16x16xf32>
    %27 = vector.extract_strided_slice %24 {offsets = [32, 0], sizes = [32, 16], strides = [1, 1]} : vector<256x16xf32> to vector<32x16xf32>
    %cst_18 = arith.constant dense<0.000000e+00> : vector<16x16xf32>
    %28 = tpu.matmul %1, %27, %cst_18 {dimension_numbers = #tpu.dot_dimension_numbers<[1], [0], [0], [1], [0, 0, 1, 1], [], []>} : vector<16x32xf32>, vector<32x16xf32>, vector<16x16xf32> -> vector<16x16xf32>
    %29 = vector.extract_strided_slice %24 {offsets = [64, 0], sizes = [32, 16], strides = [1, 1]} : vector<256x16xf32> to vector<32x16xf32>
    %cst_19 = arith.constant dense<0.000000e+00> : vector<16x16xf32>
    %30 = tpu.matmul %1, %29, %cst_19 {dimension_numbers = #tpu.dot_dimension_numbers<[1], [0], [0], [1], [0, 0, 1, 1], [], []>} : vector<16x32xf32>, vector<32x16xf32>, vector<16x16xf32> -> vector<16x16xf32>
    %31 = vector.extract_strided_slice %24 {offsets = [96, 0], sizes = [32, 16], strides = [1, 1]} : vector<256x16xf32> to vector<32x16xf32>
    %cst_20 = arith.constant dense<0.000000e+00> : vector<16x16xf32>
    %32 = tpu.matmul %1, %31, %cst_20 {dimension_numbers = #tpu.dot_dimension_numbers<[1], [0], [0], [1], [0, 0, 1, 1], [], []>} : vector<16x32xf32>, vector<32x16xf32>, vector<16x16xf32> -> vector<16x16xf32>
    %33 = vector.extract_strided_slice %24 {offsets = [128, 0], sizes = [32, 16], strides = [1, 1]} : vector<256x16xf32> to vector<32x16xf32>
    %cst_21 = arith.constant dense<0.000000e+00> : vector<16x16xf32>
    %34 = tpu.matmul %1, %33, %cst_21 {dimension_numbers = #tpu.dot_dimension_numbers<[1], [0], [0], [1], [0, 0, 1, 1], [], []>} : vector<16x32xf32>, vector<32x16xf32>, vector<16x16xf32> -> vector<16x16xf32>
    %35 = vector.extract_strided_slice %24 {offsets = [160, 0], sizes = [32, 16], strides = [1, 1]} : vector<256x16xf32> to vector<32x16xf32>
    %cst_22 = arith.constant dense<0.000000e+00> : vector<16x16xf32>
    %36 = tpu.matmul %1, %35, %cst_22 {dimension_numbers = #tpu.dot_dimension_numbers<[1], [0], [0], [1], [0, 0, 1, 1], [], []>} : vector<16x32xf32>, vector<32x16xf32>, vector<16x16xf32> -> vector<16x16xf32>
    %37 = vector.extract_strided_slice %24 {offsets = [192, 0], sizes = [32, 16], strides = [1, 1]} : vector<256x16xf32> to vector<32x16xf32>
    %cst_23 = arith.constant dense<0.000000e+00> : vector<16x16xf32>
    %38 = tpu.matmul %1, %37, %cst_23 {dimension_numbers = #tpu.dot_dimension_numbers<[1], [0], [0], [1], [0, 0, 1, 1], [], []>} : vector<16x32xf32>, vector<32x16xf32>, vector<16x16xf32> -> vector<16x16xf32>
    %39 = vector.extract_strided_slice %24 {offsets = [224, 0], sizes = [32, 16], strides = [1, 1]} : vector<256x16xf32> to vector<32x16xf32>
    %cst_24 = arith.constant dense<0.000000e+00> : vector<16x16xf32>
    %40 = tpu.matmul %1, %39, %cst_24 {dimension_numbers = #tpu.dot_dimension_numbers<[1], [0], [0], [1], [0, 0, 1, 1], [], []>} : vector<16x32xf32>, vector<32x16xf32>, vector<16x16xf32> -> vector<16x16xf32>
    %41 = tpu.concatenate %26, %28, %30, %32, %34, %36, %38, %40 in 0 : vector<16x16xf32>, vector<16x16xf32>, vector<16x16xf32>, vector<16x16xf32>, vector<16x16xf32>, vector<16x16xf32>, vector<16x16xf32>, vector<16x16xf32> -> vector<128x16xf32>
    %42 = tpu.transpose %41, [1, 0] : vector<128x16xf32> -> vector<16x128xf32>
    %c0_25 = arith.constant 0 : index
    %c128 = arith.constant 128 : index
    %43 = vector.load %arg4[%c0_25, %c128] : memref<16x512xf32, #tpu.memory_space<vmem>>, vector<16x128xf32>
    tpu.vector_store %arg4[%c0_25, %c128], %42 {strides = array<i32>} : memref<16x512xf32, #tpu.memory_space<vmem>>, vector<16x128xf32>,
    %c512 = arith.constant 512 : index
    %c0_26 = arith.constant 0 : index
    %44 = vector.load %arg3[%c512, %c0_26] : memref<1024x32xf32, #tpu.memory_space<vmem>>, vector<256x32xf32>
    %cst_27 = arith.constant dense<0.000000e+00> : vector<256x16xf32>
    %45 = tpu.matmul %44, %0, %cst_27 {dimension_numbers = #tpu.dot_dimension_numbers<[1], [0], [0], [1], [0, 0, 1, 1], [], []>} : vector<256x32xf32>, vector<32x16xf32>, vector<256x16xf32> -> vector<256x16xf32>
    %46 = vector.extract_strided_slice %45 {offsets = [0, 0], sizes = [32, 16], strides = [1, 1]} : vector<256x16xf32> to vector<32x16xf32>
    %cst_28 = arith.constant dense<0.000000e+00> : vector<16x16xf32>
    %47 = tpu.matmul %1, %46, %cst_28 {dimension_numbers = #tpu.dot_dimension_numbers<[1], [0], [0], [1], [0, 0, 1, 1], [], []>} : vector<16x32xf32>, vector<32x16xf32>, vector<16x16xf32> -> vector<16x16xf32>
    %48 = vector.extract_strided_slice %45 {offsets = [32, 0], sizes = [32, 16], strides = [1, 1]} : vector<256x16xf32> to vector<32x16xf32>
    %cst_29 = arith.constant dense<0.000000e+00> : vector<16x16xf32>
    %49 = tpu.matmul %1, %48, %cst_29 {dimension_numbers = #tpu.dot_dimension_numbers<[1], [0], [0], [1], [0, 0, 1, 1], [], []>} : vector<16x32xf32>, vector<32x16xf32>, vector<16x16xf32> -> vector<16x16xf32>
    %50 = vector.extract_strided_slice %45 {offsets = [64, 0], sizes = [32, 16], strides = [1, 1]} : vector<256x16xf32> to vector<32x16xf32>
    %cst_30 = arith.constant dense<0.000000e+00> : vector<16x16xf32>
    %51 = tpu.matmul %1, %50, %cst_30 {dimension_numbers = #tpu.dot_dimension_numbers<[1], [0], [0], [1], [0, 0, 1, 1], [], []>} : vector<16x32xf32>, vector<32x16xf32>, vector<16x16xf32> -> vector<16x16xf32>
    %52 = vector.extract_strided_slice %45 {offsets = [96, 0], sizes = [32, 16], strides = [1, 1]} : vector<256x16xf32> to vector<32x16xf32>
    %cst_31 = arith.constant dense<0.000000e+00> : vector<16x16xf32>
    %53 = tpu.matmul %1, %52, %cst_31 {dimension_numbers = #tpu.dot_dimension_numbers<[1], [0], [0], [1], [0, 0, 1, 1], [], []>} : vector<16x32xf32>, vector<32x16xf32>, vector<16x16xf32> -> vector<16x16xf32>
    %54 = vector.extract_strided_slice %45 {offsets = [128, 0], sizes = [32, 16], strides = [1, 1]} : vector<256x16xf32> to vector<32x16xf32>
    %cst_32 = arith.constant dense<0.000000e+00> : vector<16x16xf32>
    %55 = tpu.matmul %1, %54, %cst_32 {dimension_numbers = #tpu.dot_dimension_numbers<[1], [0], [0], [1], [0, 0, 1, 1], [], []>} : vector<16x32xf32>, vector<32x16xf32>, vector<16x16xf32> -> vector<16x16xf32>
    %56 = vector.extract_strided_slice %45 {offsets = [160, 0], sizes = [32, 16], strides = [1, 1]} : vector<256x16xf32> to vector<32x16xf32>
    %cst_33 = arith.constant dense<0.000000e+00> : vector<16x16xf32>
    %57 = tpu.matmul %1, %56, %cst_33 {dimension_numbers = #tpu.dot_dimension_numbers<[1], [0], [0], [1], [0, 0, 1, 1], [], []>} : vector<16x32xf32>, vector<32x16xf32>, vector<16x16xf32> -> vector<16x16xf32>
    %58 = vector.extract_strided_slice %45 {offsets = [192, 0], sizes = [32, 16], strides = [1, 1]} : vector<256x16xf32> to vector<32x16xf32>
    %cst_34 = arith.constant dense<0.000000e+00> : vector<16x16xf32>
    %59 = tpu.matmul %1, %58, %cst_34 {dimension_numbers = #tpu.dot_dimension_numbers<[1], [0], [0], [1], [0, 0, 1, 1], [], []>} : vector<16x32xf32>, vector<32x16xf32>, vector<16x16xf32> -> vector<16x16xf32>
    %60 = vector.extract_strided_slice %45 {offsets = [224, 0], sizes = [32, 16], strides = [1, 1]} : vector<256x16xf32> to vector<32x16xf32>
    %cst_35 = arith.constant dense<0.000000e+00> : vector<16x16xf32>
    %61 = tpu.matmul %1, %60, %cst_35 {dimension_numbers = #tpu.dot_dimension_numbers<[1], [0], [0], [1], [0, 0, 1, 1], [], []>} : vector<16x32xf32>, vector<32x16xf32>, vector<16x16xf32> -> vector<16x16xf32>
    %62 = tpu.concatenate %47, %49, %51, %53, %55, %57, %59, %61 in 0 : vector<16x16xf32>, vector<16x16xf32>, vector<16x16xf32>, vector<16x16xf32>, vector<16x16xf32>, vector<16x16xf32>, vector<16x16xf32>, vector<16x16xf32> -> vector<128x16xf32>
    %63 = tpu.transpose %62, [1, 0] : vector<128x16xf32> -> vector<16x128xf32>
    %c0_36 = arith.constant 0 : index
    %c256_37 = arith.constant 256 : index
    %64 = vector.load %arg4[%c0_36, %c256_37] : memref<16x512xf32, #tpu.memory_space<vmem>>, vector<16x128xf32>
    tpu.vector_store %arg4[%c0_36, %c256_37], %63 {strides = array<i32>} : memref<16x512xf32, #tpu.memory_space<vmem>>, vector<16x128xf32>,
    %c768 = arith.constant 768 : index
    %c0_38 = arith.constant 0 : index
    %65 = vector.load %arg3[%c768, %c0_38] : memref<1024x32xf32, #tpu.memory_space<vmem>>, vector<256x32xf32>
    %cst_39 = arith.constant dense<0.000000e+00> : vector<256x16xf32>
    %66 = tpu.matmul %65, %0, %cst_39 {dimension_numbers = #tpu.dot_dimension_numbers<[1], [0], [0], [1], [0, 0, 1, 1], [], []>} : vector<256x32xf32>, vector<32x16xf32>, vector<256x16xf32> -> vector<256x16xf32>
    %67 = vector.extract_strided_slice %66 {offsets = [0, 0], sizes = [32, 16], strides = [1, 1]} : vector<256x16xf32> to vector<32x16xf32>
    %cst_40 = arith.constant dense<0.000000e+00> : vector<16x16xf32>
    %68 = tpu.matmul %1, %67, %cst_40 {dimension_numbers = #tpu.dot_dimension_numbers<[1], [0], [0], [1], [0, 0, 1, 1], [], []>} : vector<16x32xf32>, vector<32x16xf32>, vector<16x16xf32> -> vector<16x16xf32>
    %69 = vector.extract_strided_slice %66 {offsets = [32, 0], sizes = [32, 16], strides = [1, 1]} : vector<256x16xf32> to vector<32x16xf32>
    %cst_41 = arith.constant dense<0.000000e+00> : vector<16x16xf32>
    %70 = tpu.matmul %1, %69, %cst_41 {dimension_numbers = #tpu.dot_dimension_numbers<[1], [0], [0], [1], [0, 0, 1, 1], [], []>} : vector<16x32xf32>, vector<32x16xf32>, vector<16x16xf32> -> vector<16x16xf32>
    %71 = vector.extract_strided_slice %66 {offsets = [64, 0], sizes = [32, 16], strides = [1, 1]} : vector<256x16xf32> to vector<32x16xf32>
    %cst_42 = arith.constant dense<0.000000e+00> : vector<16x16xf32>
    %72 = tpu.matmul %1, %71, %cst_42 {dimension_numbers = #tpu.dot_dimension_numbers<[1], [0], [0], [1], [0, 0, 1, 1], [], []>} : vector<16x32xf32>, vector<32x16xf32>, vector<16x16xf32> -> vector<16x16xf32>
    %73 = vector.extract_strided_slice %66 {offsets = [96, 0], sizes = [32, 16], strides = [1, 1]} : vector<256x16xf32> to vector<32x16xf32>
    %cst_43 = arith.constant dense<0.000000e+00> : vector<16x16xf32>
    %74 = tpu.matmul %1, %73, %cst_43 {dimension_numbers = #tpu.dot_dimension_numbers<[1], [0], [0], [1], [0, 0, 1, 1], [], []>} : vector<16x32xf32>, vector<32x16xf32>, vector<16x16xf32> -> vector<16x16xf32>
    %75 = vector.extract_strided_slice %66 {offsets = [128, 0], sizes = [32, 16], strides = [1, 1]} : vector<256x16xf32> to vector<32x16xf32>
    %cst_44 = arith.constant dense<0.000000e+00> : vector<16x16xf32>
    %76 = tpu.matmul %1, %75, %cst_44 {dimension_numbers = #tpu.dot_dimension_numbers<[1], [0], [0], [1], [0, 0, 1, 1], [], []>} : vector<16x32xf32>, vector<32x16xf32>, vector<16x16xf32> -> vector<16x16xf32>
    %77 = vector.extract_strided_slice %66 {offsets = [160, 0], sizes = [32, 16], strides = [1, 1]} : vector<256x16xf32> to vector<32x16xf32>
    %cst_45 = arith.constant dense<0.000000e+00> : vector<16x16xf32>
    %78 = tpu.matmul %1, %77, %cst_45 {dimension_numbers = #tpu.dot_dimension_numbers<[1], [0], [0], [1], [0, 0, 1, 1], [], []>} : vector<16x32xf32>, vector<32x16xf32>, vector<16x16xf32> -> vector<16x16xf32>
    %79 = vector.extract_strided_slice %66 {offsets = [192, 0], sizes = [32, 16], strides = [1, 1]} : vector<256x16xf32> to vector<32x16xf32>
    %cst_46 = arith.constant dense<0.000000e+00> : vector<16x16xf32>
    %80 = tpu.matmul %1, %79, %cst_46 {dimension_numbers = #tpu.dot_dimension_numbers<[1], [0], [0], [1], [0, 0, 1, 1], [], []>} : vector<16x32xf32>, vector<32x16xf32>, vector<16x16xf32> -> vector<16x16xf32>
    %81 = vector.extract_strided_slice %66 {offsets = [224, 0], sizes = [32, 16], strides = [1, 1]} : vector<256x16xf32> to vector<32x16xf32>
    %cst_47 = arith.constant dense<0.000000e+00> : vector<16x16xf32>
    %82 = tpu.matmul %1, %81, %cst_47 {dimension_numbers = #tpu.dot_dimension_numbers<[1], [0], [0], [1], [0, 0, 1, 1], [], []>} : vector<16x32xf32>, vector<32x16xf32>, vector<16x16xf32> -> vector<16x16xf32>
    %83 = tpu.concatenate %68, %70, %72, %74, %76, %78, %80, %82 in 0 : vector<16x16xf32>, vector<16x16xf32>, vector<16x16xf32>, vector<16x16xf32>, vector<16x16xf32>, vector<16x16xf32>, vector<16x16xf32>, vector<16x16xf32> -> vector<128x16xf32>
    %84 = tpu.transpose %83, [1, 0] : vector<128x16xf32> -> vector<16x128xf32>
    %c0_48 = arith.constant 0 : index
    %c384 = arith.constant 384 : index
    %85 = vector.load %arg4[%c0_48, %c384] : memref<16x512xf32, #tpu.memory_space<vmem>>, vector<16x128xf32>
    tpu.vector_store %arg4[%c0_48, %c384], %84 {strides = array<i32>} : memref<16x512xf32, #tpu.memory_space<vmem>>, vector<16x128xf32>,
    return
  }
  func.func @transform_0(%arg0: i32) -> (i32, i32) {
    %c0_i32 = arith.constant 0 : i32
    %c0_i32_0 = arith.constant 0 : i32
    %c0_i32_1 = arith.constant 0 : i32
    return %c0_i32, %c0_i32_0 : i32, i32
  }
  func.func @transform_1(%arg0: i32) -> (i32, i32) {
    %c0_i32 = arith.constant 0 : i32
    %c0_i32_0 = arith.constant 0 : i32
    %c0_i32_1 = arith.constant 0 : i32
    return %c0_i32, %c0_i32_0 : i32, i32
  }
  func.func @transform_2(%arg0: i32) -> (i32, i32) {
    %c0_i32 = arith.constant 0 : i32
    %c0_i32_0 = arith.constant 0 : i32
    return %arg0, %c0_i32 : i32, i32
  }
  func.func @transform_3(%arg0: i32) -> (i32, i32) {
    %c0_i32 = arith.constant 0 : i32
    %c0_i32_0 = arith.constant 0 : i32
    return %c0_i32, %arg0 : i32, i32
  }
}

</mosaic_0001>

<bundles_post_ra>
// kernel: tpu_custom_call.1
= control target key start
LH: loop header
LB: loop body
LE: loop exit
PB: predicated region body
PF: predicated region fallthrough
CT: control target
= control target key end

     0   :  { %8 = vsyncpa [#allocation3], 0  ;;  %s6027_s0 = inlined_call_operand.vmem [shape: f32[32,16], index: 0, kind: input, shape index: {}]   ;;  %s6028_s1 = inlined_call_operand.vmem [shape: f32[16,32], index: 1, kind: input, shape index: {}]   ;;  %s6029_s2 = inlined_call_operand.vmem [shape: f32[2048,32], index: 2, kind: input, shape index: {}]   ;;  %s6030_s3 = inlined_call_operand.hbm [shape: f32[16,1024], index: 3, kind: output, shape index: {}]  }
   0x1   :  { %10 = vsyncpa [#allocation3 + $0x1], 0  ;;  %s5456_s12 = smov 0   ;;  %s5458_s13 = smov 0  }
   0x2   :  { %s5460_s14 = smov 0   ;;  %s5462_s15 = smov 0  }
   0x3 LB: > { %s5477_s16 = sadd.s32 4294967295, %s5430_s15   ;;  %s4209_s17 = sadd.s32 4294967294, %s5430_s15   ;;  %s5430_s15 = sphi %s5462_s15, %s6036_s15   ;;  %s5426_s14 = sphi %s5460_s14, %s6035_s14   ;;  %s5422_s13 = sphi %s5458_s13, %s6034_s13   ;;  %s5418_s12 = sphi %s5456_s12, %s6033_s12  }
   0x4   : > { %s5481_s18 = sadd.s32 1, %s5430_s15   ;;  %s91_s19 = sadd.s32 1, %s5426_s14 }
   0x5   : > { %s88_s20 = ssub.s32 %s5430_s15, %s5481_s18  ;;  %p101_p0 = scmp.ne.s32.totalorder %s5426_s14, %s5422_s13 }
   0x6   : > { %p89_p1 = scmp.eq.s32.totalorder %s88_s20, 0  ;;  %p102_p2 = scmp.eq.s32.totalorder %s5477_s16, 1 }
   0x7   : > { %p107_p3 = scmp.ne.s32.totalorder %s5422_s13, %s5418_s12  ;;  %p108_p4 = scmp.eq.s32.totalorder %s4209_s17, 1 }
   0x8   : > { %s5492_s21 = scalar_select %p89_p1, %s5426_s14, %s91_s19  }
   0x9   : > { %p5494_p5 = por %p102_p2, %p101_p0  ;;  %p5498_p6 = por %p108_p4, %p107_p3 }
   0xa   : > { %p4212_p7 = scmp.ge.s32.totalorder %s5430_s15, 1  ;;  %p141_p8 = scmp.lt.s32.totalorder %s5430_s15, 3 }
   0xc   : > { %p142_p9 = pnand %p4212_p7, %p141_p8 }
   0xd   : > { %s4214_s28 = sshll.u32 (!%p142_p9), %s5477_s16, 7  ;;  %s162_s27 = sand.u32 (!%p142_p9), 1, %s5422_s13  }
   0xe   : > { %145 = sbr.rel (%p142_p9) target bundleno = 764 (0x2fc), region = 32  ;;  %p166_p10 = scmp.lt.s32.totalorder (!%p142_p9), %s4214_s28, 255 }
   0xf   : > { %s4413_s4 = sshll.u32 (!%p142_p9), %s5477_s16, 9  ;;  %s5987_s8 = scalar_lea.sflag (!%p142_p9), [#allocation3], %s162_s27 }
  0x10   : > { %s5982_s7 = scalar_lea.hbm (!%p142_p9), %s6030_s3, %s4413_s4  ;;  %s5432_s16 = smov (!%p142_p9), [#allocation2]  }
  0x11   : > { %s5374_s10 = sshll.u32 (!%p142_p9), %s5432_s16, 4  ;;  %s5375_s10 = int_to_ptr.vmem [resolvable:$false] %s5374_s10 }
  0x12   : > { %s5376_s11 = scalar_lea.vmem (!%p142_p9), %s5375_s10, 2048 }
  0x13   : > { %v5507_v0 = vld [vmem:[%s6027_s0 + $0x18] sm:$0xff]  ;;  %v5512_v1 = vld [vmem:[%s6027_s0 + $0x10] sm:$0xff]  ;;  %v5520_v2 = vld [vmem:[%s6027_s0 + $0x8] sm:$0xff]  ;;  %s6038_s28 = smov (!%p166_p10, %s4214_s28), 255  ;;  %vm210_vm0 = vcmask 261120  }
  0x14   : > { %4750 = vmatprep.subr.mxu0 %v5507_v0  ;;  %v5527_v3 = vld [vmem:[%s6027_s0] sm:$0xff]  ;;  %s4215_s6 = sshll.u32 %s6038_s28, 3  ;;  %s4213_s28 = sshll.u32 %s162_s27, 6 }
  0x15   : > { %4751 = vmatpush3.msra.mxu0 %v5507_v0  ;;  %s5534_s9 = scalar_lea.vmem %s6029_s2, %s4215_s6  ;;  %v5638_v45 = vld [vmem:[%s6028_s1] sm:$0xff]  ;;  %s5966_s29 = scalar_lea.vmem [#allocation2], %s4213_s28 }
  0x16   : > { %4752 = vmatprep.subr.mxu0 %v5512_v1  ;;  %v178_v4 = vld [vmem:[%s5534_s9] sm:$0xff]  ;;  %v179_v5 = vld [vmem:[%s5534_s9 + $0x8] sm:$0xff]  ;;  %v180_v6 = vld [vmem:[%s5534_s9 + $0x10] sm:$0xff]  ;;  %4814 = vmatprep.mubr.msk.f32.mxu1 %vm210_vm0, %v5638_v45  ;;  %s4147_s30 = sshll.u32 %s5966_s29, 4  ;;  %s5976_s30 = int_to_ptr.vmem [resolvable:$true] %s4147_s30 }
  0x17   : > { %4753 = vmatpush3.msra.mxu0 %v5512_v1  ;;  %4758 = vmatprep.mubr.msk.f32.mxu0 %vm210_vm0, %v178_v4  ;;  %v181_v7 = vld [vmem:[%s5534_s9 + $0x18] sm:$0xff]  ;;  %v182_v8 = vld [vmem:[%s5534_s9 + $0x20] sm:$0xff]  ;;  %v183_v9 = vld [vmem:[%s5534_s9 + $0x28] sm:$0xff]  ;;  %p5377_p0 = scmp.lt.s32.totalorder %s5976_s30, %s5375_s10 }
  0x18   : > { %4754 = vmatprep.subr.mxu0 %v5520_v2  ;;  %v184_v10 = vld [vmem:[%s5534_s9 + $0x30] sm:$0xff]  ;;  %v185_v11 = vld [vmem:[%s5534_s9 + $0x38] sm:$0xff]  ;;  %v186_v12 = vld [vmem:[%s5534_s9 + $0x40] sm:$0xff] }
  0x19   : > { %4755 = vmatpush3.msra.mxu0 %v5520_v2  ;;  %v187_v13 = vld [vmem:[%s5534_s9 + $0x48] sm:$0xff]  ;;  %v188_v14 = vld [vmem:[%s5534_s9 + $0x50] sm:$0xff]  ;;  %v189_v15 = vld [vmem:[%s5534_s9 + $0x58] sm:$0xff] }
  0x1a   : > { %4756 = vmatprep.subr.mxu0 %v5527_v3  ;;  %v190_v16 = vld [vmem:[%s5534_s9 + $0x60] sm:$0xff]  ;;  %v191_v17 = vld [vmem:[%s5534_s9 + $0x68] sm:$0xff]  ;;  %v192_v18 = vld [vmem:[%s5534_s9 + $0x70] sm:$0xff] }
  0x1b   : > { %4757 = vmatpush3.msra.mxu0 %v5527_v3  ;;  %v193_v19 = vld [vmem:[%s5534_s9 + $0x78] sm:$0xff]  ;;  %v194_v20 = vld [vmem:[%s5534_s9 + $0x80] sm:$0xff]  ;;  %v195_v21 = vld [vmem:[%s5534_s9 + $0x88] sm:$0xff] }
  0x1c   : > { %4759 = vmatmul.mubr.msk.f32.vlgmr.msra.gmra.mxu0 %vm210_vm0, %v179_v5  ;;  %4894 = vmatprep.subr.mxu0 %v5507_v0  ;;  %v196_v22 = vld [vmem:[%s5534_s9 + $0x90] sm:$0xff]  ;;  %v197_v23 = vld [vmem:[%s5534_s9 + $0x98] sm:$0xff]  ;;  %v198_v24 = vld [vmem:[%s5534_s9 + $0xa0] sm:$0xff] }
  0x1d   : > { %4895 = vmatpush3.msra.mxu0 %v5507_v0  ;;  %4761 = vmatprep.mubr.msk.f32.mxu0 %vm210_vm0, %v180_v6  ;;  %v199_v25 = vld [vmem:[%s5534_s9 + $0xa8] sm:$0xff]  ;;  %v200_v26 = vld [vmem:[%s5534_s9 + $0xb0] sm:$0xff]  ;;  %v201_v27 = vld [vmem:[%s5534_s9 + $0xb8] sm:$0xff] }
  0x1e   : > { %4896 = vmatprep.subr.mxu0 %v5512_v1  ;;  %v202_v28 = vld [vmem:[%s5534_s9 + $0xc0] sm:$0xff]  ;;  %v203_v29 = vld [vmem:[%s5534_s9 + $0xc8] sm:$0xff]  ;;  %v204_v30 = vld [vmem:[%s5534_s9 + $0xd0] sm:$0xff] }
  0x1f   : > { %4897 = vmatpush3.msra.mxu0 %v5512_v1  ;;  %v205_v31 = vld [vmem:[%s5534_s9 + $0xd8] sm:$0xff]  ;;  %v206_v32 = vld [vmem:[%s5534_s9 + $0xe0] sm:$0xff]  ;;  %v207_v33 = vld [vmem:[%s5534_s9 + $0xe8] sm:$0xff] }
  0x20   : > { %4762 = vmatmul.mubr.msk.f32.gmra.mxu0 %vm210_vm0, %v181_v7  ;;  %4898 = vmatprep.subr.mxu0 %v5520_v2  ;;  %v208_v34 = vld [vmem:[%s5534_s9 + $0xf0] sm:$0xff]  ;;  %v209_v35 = vld [vmem:[%s5534_s9 + $0xf8] sm:$0xff]  ;;  %v1172_v36 = vld [vmem:[%s5534_s9 + $0x100] sm:$0xff] }
  0x21   : > { %4764 = vmatprep.mubr.msk.f32.mxu0 %vm210_vm0, %v182_v8  ;;  %4899 = vmatpush3.msra.mxu0 %v5520_v2  ;;  %v1173_v37 = vld [vmem:[%s5534_s9 + $0x108] sm:$0xff]  ;;  %v1174_v38 = vld [vmem:[%s5534_s9 + $0x110] sm:$0xff]  ;;  %v1175_v39 = vld [vmem:[%s5534_s9 + $0x118] sm:$0xff] }
  0x22   : > { %4900 = vmatprep.subr.mxu0 %v5527_v3  ;;  %v1176_v40 = vld [vmem:[%s5534_s9 + $0x120] sm:$0xff]  ;;  %v1177_v41 = vld [vmem:[%s5534_s9 + $0x128] sm:$0xff]  ;;  %v1178_v42 = vld [vmem:[%s5534_s9 + $0x130] sm:$0xff] }
  0x23   : > { %4901 = vmatpush3.msra.mxu0 %v5527_v3  ;;  %v1179_v43 = vld [vmem:[%s5534_s9 + $0x138] sm:$0xff]  ;;  %v1180_v44 = vld [vmem:[%s5534_s9 + $0x140] sm:$0xff]  ;;  %v1181_v46 = vld [vmem:[%s5534_s9 + $0x148] sm:$0xff] }
  0x24   : > { %4765 = vmatmul.mubr.msk.f32.gmra.mxu0 %vm210_vm0, %v183_v9  ;;  %5038 = vmatprep.subr.mxu0 %v5507_v0  ;;  %v1182_v47 = vld [vmem:[%s5534_s9 + $0x150] sm:$0xff]  ;;  %v1183_v48 = vld [vmem:[%s5534_s9 + $0x158] sm:$0xff]  ;;  %v1184_v49 = vld [vmem:[%s5534_s9 + $0x160] sm:$0xff] }
  0x25   : > { %4767 = vmatprep.mubr.msk.f32.mxu0 %vm210_vm0, %v184_v10  ;;  %v1185_v50 = vld [vmem:[%s5534_s9 + $0x168] sm:$0xff]  ;;  %v1186_v51 = vld [vmem:[%s5534_s9 + $0x170] sm:$0xff]  ;;  %v1187_v52 = vld [vmem:[%s5534_s9 + $0x178] sm:$0xff] }
  0x26   : > { %v1188_v53 = vld [vmem:[%s5534_s9 + $0x180] sm:$0xff]  ;;  %v1189_v54 = vld [vmem:[%s5534_s9 + $0x188] sm:$0xff]  ;;  %v1190_v55 = vld [vmem:[%s5534_s9 + $0x190] sm:$0xff] }
  0x27   : > { %v1191_v56 = vld [vmem:[%s5534_s9 + $0x198] sm:$0xff]  ;;  %v1192_v57 = vld [vmem:[%s5534_s9 + $0x1a0] sm:$0xff]  ;;  %v1193_v58 = vld [vmem:[%s5534_s9 + $0x1a8] sm:$0xff] }
  0x28   : > { %4768 = vmatmul.mubr.msk.f32.gmra.mxu0 %vm210_vm0, %v185_v11  ;;  %v1194_v59 = vld [vmem:[%s5534_s9 + $0x1b0] sm:$0xff]  ;;  %v1195_v60 = vld [vmem:[%s5534_s9 + $0x1b8] sm:$0xff]  ;;  %v1196_v61 = vld [vmem:[%s5534_s9 + $0x1c0] sm:$0xff] }
  0x29   : > { %4770 = vmatprep.mubr.msk.f32.mxu0 %vm210_vm0, %v186_v12  ;;  %v1197_v62 = vld [vmem:[%s5534_s9 + $0x1c8] sm:$0xff]  ;;  %v1198_v63 = vld [vmem:[%s5534_s9 + $0x1d0] sm:$0xff]  ;;  %v1199_v4 = vld [vmem:[%s5534_s9 + $0x1d8] sm:$0xff] }
  0x2a   : > { %v1200_v5 = vld [vmem:[%s5534_s9 + $0x1e0] sm:$0xff]  ;;  %v1201_v6 = vld [vmem:[%s5534_s9 + $0x1e8] sm:$0xff]  ;;  %v1202_v7 = vld [vmem:[%s5534_s9 + $0x1f0] sm:$0xff] }
  0x2b   : > { %v1203_v8 = vld [vmem:[%s5534_s9 + $0x1f8] sm:$0xff]  ;;  %v2159_v9 = vld [vmem:[%s5534_s9 + $0x200] sm:$0xff]  ;;  %v2160_v10 = vld [vmem:[%s5534_s9 + $0x208] sm:$0xff] }
  0x2c   : > { %4771 = vmatmul.mubr.msk.f32.gmra.mxu0 %vm210_vm0, %v187_v13  ;;  %v2161_v11 = vld [vmem:[%s5534_s9 + $0x210] sm:$0xff]  ;;  %v2162_v12 = vld [vmem:[%s5534_s9 + $0x218] sm:$0xff]  ;;  %v2163_v13 = vld [vmem:[%s5534_s9 + $0x220] sm:$0xff] }
  0x2d   : > { %4773 = vmatprep.mubr.msk.f32.mxu0 %vm210_vm0, %v188_v14  ;;  %v2165_v14 = vld [vmem:[%s5534_s9 + $0x230] sm:$0xff] }
  0x30   : > { %4774 = vmatmul.mubr.msk.f32.gmra.mxu0 %vm210_vm0, %v189_v15  ;;  %v2167_v15 = vld [vmem:[%s5534_s9 + $0x240] sm:$0xff] }
  0x31   : > { %4776 = vmatprep.mubr.msk.f32.mxu0 %vm210_vm0, %v190_v16  ;;  %v2169_v16 = vld [vmem:[%s5534_s9 + $0x250] sm:$0xff] }
  0x34   : > { %4777 = vmatmul.mubr.msk.f32.gmra.mxu0 %vm210_vm0, %v191_v17  ;;  %v2171_v17 = vld [vmem:[%s5534_s9 + $0x260] sm:$0xff] }
  0x35   : > { %4779 = vmatprep.mubr.msk.f32.mxu0 %vm210_vm0, %v192_v18  ;;  %v2172_v18 = vld [vmem:[%s5534_s9 + $0x268] sm:$0xff] }
  0x38   : > { %4780 = vmatmul.mubr.msk.f32.gmra.mxu0 %vm210_vm0, %v193_v19  ;;  %v2173_v19 = vld [vmem:[%s5534_s9 + $0x270] sm:$0xff] }
  0x39   : > { %4782 = vmatprep.mubr.msk.f32.mxu0 %vm210_vm0, %v194_v20  ;;  %v2174_v20 = vld [vmem:[%s5534_s9 + $0x278] sm:$0xff] }
  0x3c   : > { %4783 = vmatmul.mubr.msk.f32.gmra.mxu0 %vm210_vm0, %v195_v21  ;;  %v2175_v21 = vld [vmem:[%s5534_s9 + $0x280] sm:$0xff] }
  0x3d   : > { %4785 = vmatprep.mubr.msk.f32.mxu0 %vm210_vm0, %v196_v22  ;;  %v2176_v22 = vld [vmem:[%s5534_s9 + $0x288] sm:$0xff] }
  0x40   : > { %4786 = vmatmul.mubr.msk.f32.gmra.mxu0 %vm210_vm0, %v197_v23  ;;  %v2177_v23 = vld [vmem:[%s5534_s9 + $0x290] sm:$0xff] }
  0x41   : > { %4788 = vmatprep.mubr.msk.f32.mxu0 %vm210_vm0, %v198_v24  ;;  %v2178_v24 = vld [vmem:[%s5534_s9 + $0x298] sm:$0xff] }
  0x44   : > { %4789 = vmatmul.mubr.msk.f32.gmra.mxu0 %vm210_vm0, %v199_v25  ;;  %v2179_v25 = vld [vmem:[%s5534_s9 + $0x2a0] sm:$0xff] }
  0x45   : > { %4791 = vmatprep.mubr.msk.f32.mxu0 %vm210_vm0, %v200_v26  ;;  %v2180_v26 = vld [vmem:[%s5534_s9 + $0x2a8] sm:$0xff] }
  0x48   : > { %4792 = vmatmul.mubr.msk.f32.gmra.mxu0 %vm210_vm0, %v201_v27  ;;  %v2181_v27 = vld [vmem:[%s5534_s9 + $0x2b0] sm:$0xff] }
  0x49   : > { %4794 = vmatprep.mubr.msk.f32.mxu0 %vm210_vm0, %v202_v28  ;;  %v2182_v28 = vld [vmem:[%s5534_s9 + $0x2b8] sm:$0xff] }
  0x4c   : > { %4795 = vmatmul.mubr.msk.f32.gmra.mxu0 %vm210_vm0, %v203_v29  ;;  %v2183_v29 = vld [vmem:[%s5534_s9 + $0x2c0] sm:$0xff] }
  0x4d   : > { %4797 = vmatprep.mubr.msk.f32.mxu0 %vm210_vm0, %v204_v30  ;;  %v2184_v30 = vld [vmem:[%s5534_s9 + $0x2c8] sm:$0xff] }
  0x50   : > { %4798 = vmatmul.mubr.msk.f32.gmra.mxu0 %vm210_vm0, %v205_v31  ;;  %v2185_v31 = vld [vmem:[%s5534_s9 + $0x2d0] sm:$0xff] }
  0x51   : > { %4800 = vmatprep.mubr.msk.f32.mxu0 %vm210_vm0, %v206_v32  ;;  %v2186_v32 = vld [vmem:[%s5534_s9 + $0x2d8] sm:$0xff] }
  0x54   : > { %4801 = vmatmul.mubr.msk.f32.gmra.mxu0 %vm210_vm0, %v207_v33  ;;  %v2187_v33 = vld [vmem:[%s5534_s9 + $0x2e0] sm:$0xff] }
  0x55   : > { %4803 = vmatprep.mubr.msk.f32.mxu0 %vm210_vm0, %v208_v34  ;;  %v2188_v34 = vld [vmem:[%s5534_s9 + $0x2e8] sm:$0xff] }
  0x58   : > { %4804 = vmatmul.mubr.msk.f32.gmra.mxu0 %vm210_vm0, %v209_v35  ;;  %v2189_v35 = vld [vmem:[%s5534_s9 + $0x2f0] sm:$0xff] }
  0x59   : > { %4902 = vmatprep.mubr.msk.f32.mxu0 %vm210_vm0, %v1172_v36  ;;  %v2190_v36 = vld [vmem:[%s5534_s9 + $0x2f8] sm:$0xff] }
  0x5c   : > { %4903 = vmatmul.mubr.msk.f32.vlgmr.msra.gmra.mxu0 %vm210_vm0, %v1173_v37  ;;  %v3146_v37 = vld [vmem:[%s5534_s9 + $0x300] sm:$0xff] }
  0x5d   : > { %5039 = vmatpush3.msra.mxu0 %v5507_v0  ;;  %4905 = vmatprep.mubr.msk.f32.mxu0 %vm210_vm0, %v1174_v38  ;;  %v3147_v38 = vld [vmem:[%s5534_s9 + $0x308] sm:$0xff] }
  0x5e   : > { %5040 = vmatprep.subr.mxu0 %v5512_v1 }
  0x5f   : > { %5041 = vmatpush3.msra.mxu0 %v5512_v1 }
  0x60   : > { %4906 = vmatmul.mubr.msk.f32.gmra.mxu0 %vm210_vm0, %v1175_v39  ;;  %5042 = vmatprep.subr.mxu0 %v5520_v2  ;;  %v3148_v39 = vld [vmem:[%s5534_s9 + $0x310] sm:$0xff] }
  0x61   : > { %4908 = vmatprep.mubr.msk.f32.mxu0 %vm210_vm0, %v1176_v40  ;;  %5043 = vmatpush3.msra.mxu0 %v5520_v2 }
  0x62   : > { %5044 = vmatprep.subr.mxu0 %v5527_v3 }
  0x63   : > { %5045 = vmatpush3.msra.mxu0 %v5527_v3 }
  0x64   : > { %4909 = vmatmul.mubr.msk.f32.gmra.mxu0 %vm210_vm0, %v1177_v41  ;;  %5182 = vmatprep.subr.mxu0 %v5507_v0  ;;  %v3149_v41 = vld [vmem:[%s5534_s9 + $0x318] sm:$0xff] }
  0x65   : > { %4911 = vmatprep.mubr.msk.f32.mxu0 %vm210_vm0, %v1178_v42 }
  0x68   : > { %4912 = vmatmul.mubr.msk.f32.gmra.mxu0 %vm210_vm0, %v1179_v43  ;;  %v3150_v43 = vld [vmem:[%s5534_s9 + $0x320] sm:$0xff] }
  0x69   : > { %4914 = vmatprep.mubr.msk.f32.mxu0 %vm210_vm0, %v1180_v44 }
  0x6c   : > { %4915 = vmatmul.mubr.msk.f32.gmra.mxu0 %vm210_vm0, %v1181_v46  ;;  %v3151_v46 = vld [vmem:[%s5534_s9 + $0x328] sm:$0xff] }
  0x6d   : > { %4917 = vmatprep.mubr.msk.f32.mxu0 %vm210_vm0, %v1182_v47 }
  0x70   : > { %4918 = vmatmul.mubr.msk.f32.gmra.mxu0 %vm210_vm0, %v1183_v48  ;;  %v3152_v48 = vld [vmem:[%s5534_s9 + $0x330] sm:$0xff] }
  0x71   : > { %4920 = vmatprep.mubr.msk.f32.mxu0 %vm210_vm0, %v1184_v49 }
  0x74   : > { %4921 = vmatmul.mubr.msk.f32.gmra.mxu0 %vm210_vm0, %v1185_v50  ;;  %v3153_v50 = vld [vmem:[%s5534_s9 + $0x338] sm:$0xff] }
  0x75   : > { %4923 = vmatprep.mubr.msk.f32.mxu0 %vm210_vm0, %v1186_v51 }
  0x78   : > { %4924 = vmatmul.mubr.msk.f32.gmra.mxu0 %vm210_vm0, %v1187_v52  ;;  %v5779_v52 = vld [vmem:[%s6028_s1 + $0x8] sm:$0xff] }
  0x79   : > { %4926 = vmatprep.mubr.msk.f32.mxu0 %vm210_vm0, %v1188_v53  ;;  %v3154_v53 = vld [vmem:[%s5534_s9 + $0x340] sm:$0xff] }
  0x7c   : > { %4927 = vmatmul.mubr.msk.f32.gmra.mxu0 %vm210_vm0, %v1189_v54 }
  0x7d   : > { %4929 = vmatprep.mubr.msk.f32.mxu0 %vm210_vm0, %v1190_v55  ;;  %v3155_v55 = vld [vmem:[%s5534_s9 + $0x348] sm:$0xff] }
  0x80   : > { %4930 = vmatmul.mubr.msk.f32.gmra.mxu0 %vm210_vm0, %v1191_v56 }
  0x81   : > { %4932 = vmatprep.mubr.msk.f32.mxu0 %vm210_vm0, %v1192_v57  ;;  %v3156_v57 = vld [vmem:[%s5534_s9 + $0x350] sm:$0xff] }
  0x84   : > { %4933 = vmatmul.mubr.msk.f32.gmra.mxu0 %vm210_vm0, %v1193_v58 }
  0x85   : > { %4935 = vmatprep.mubr.msk.f32.mxu0 %vm210_vm0, %v1194_v59  ;;  %v3157_v59 = vld [vmem:[%s5534_s9 + $0x358] sm:$0xff] }
  0x88   : > { %4936 = vmatmul.mubr.msk.f32.gmra.mxu0 %vm210_vm0, %v1195_v60 }
  0x89   : > { %4938 = vmatprep.mubr.msk.f32.mxu0 %vm210_vm0, %v1196_v61  ;;  %v3158_v61 = vld [vmem:[%s5534_s9 + $0x360] sm:$0xff] }
  0x8c   : > { %4939 = vmatmul.mubr.msk.f32.gmra.mxu0 %vm210_vm0, %v1197_v62 }
  0x8d   : > { %4941 = vmatprep.mubr.msk.f32.mxu0 %vm210_vm0, %v1198_v63  ;;  %v3159_v63 = vld [vmem:[%s5534_s9 + $0x368] sm:$0xff] }
  0x90   : > { %4942 = vmatmul.mubr.msk.f32.gmra.mxu0 %vm210_vm0, %v1199_v4 }
  0x91   : > { %4944 = vmatprep.mubr.msk.f32.mxu0 %vm210_vm0, %v1200_v5  ;;  %v3160_v5 = vld [vmem:[%s5534_s9 + $0x370] sm:$0xff] }
  0x94   : > { %4945 = vmatmul.mubr.msk.f32.gmra.mxu0 %vm210_vm0, %v1201_v6 }
  0x95   : > { %4947 = vmatprep.mubr.msk.f32.mxu0 %vm210_vm0, %v1202_v7  ;;  %v3161_v7 = vld [vmem:[%s5534_s9 + $0x378] sm:$0xff] }
  0x98   : > { %4948 = vmatmul.mubr.msk.f32.gmra.mxu0 %vm210_vm0, %v1203_v8 }
  0x99   : > { %5046 = vmatprep.mubr.msk.f32.mxu0 %vm210_vm0, %v2159_v9  ;;  %v3162_v9 = vld [vmem:[%s5534_s9 + $0x380] sm:$0xff] }
  0x9c   : > { %5047 = vmatmul.mubr.msk.f32.vlgmr.msra.gmra.mxu0 %vm210_vm0, %v2160_v10 }
  0x9d   : > { %5183 = vmatpush3.msra.mxu0 %v5507_v0  ;;  %5049 = vmatprep.mubr.msk.f32.mxu0 %vm210_vm0, %v2161_v11  ;;  %v2164_v0 = vld [vmem:[%s5534_s9 + $0x228] sm:$0xff] }
  0x9e   : > { %5184 = vmatprep.subr.mxu0 %v5512_v1  ;;  %v3163_v11 = vld [vmem:[%s5534_s9 + $0x388] sm:$0xff] }
  0x9f   : > { %5185 = vmatpush3.msra.mxu0 %v5512_v1  ;;  %v2166_v1 = vld [vmem:[%s5534_s9 + $0x238] sm:$0xff] }
  0xa0   : > { %5050 = vmatmul.mubr.msk.f32.gmra.mxu0 %vm210_vm0, %v2162_v12  ;;  %5186 = vmatprep.subr.mxu0 %v5520_v2 }
  0xa1   : > { %5052 = vmatprep.mubr.msk.f32.mxu0 %vm210_vm0, %v2163_v13  ;;  %5187 = vmatpush3.msra.mxu0 %v5520_v2  ;;  %v2168_v2 = vld [vmem:[%s5534_s9 + $0x248] sm:$0xff]  ;;  %v3164_v13 = vld [vmem:[%s5534_s9 + $0x390] sm:$0xff] }
  0xa2   : > { %5188 = vmatprep.subr.mxu0 %v5527_v3 }
  0xa3   : > { %5189 = vmatpush3.msra.mxu0 %v5527_v3  ;;  %v2170_v3 = vld [vmem:[%s5534_s9 + $0x258] sm:$0xff] }
  0xa4   : > { %5053 = vmatmul.mubr.msk.f32.gmra.mxu0 %vm210_vm0, %v2164_v0 }
  0xa5   : > { %5055 = vmatprep.mubr.msk.f32.mxu0 %vm210_vm0, %v2165_v14  ;;  %v3165_v14 = vld [vmem:[%s5534_s9 + $0x398] sm:$0xff] }
  0xa8   : > { %5056 = vmatmul.mubr.msk.f32.gmra.mxu0 %vm210_vm0, %v2166_v1 }
  0xa9   : > { %5058 = vmatprep.mubr.msk.f32.mxu0 %vm210_vm0, %v2167_v15  ;;  %v3166_v15 = vld [vmem:[%s5534_s9 + $0x3a0] sm:$0xff] }
  0xac   : > { %5059 = vmatmul.mubr.msk.f32.gmra.mxu0 %vm210_vm0, %v2168_v2 }
  0xad   : > { %5061 = vmatprep.mubr.msk.f32.mxu0 %vm210_vm0, %v2169_v16  ;;  %v3167_v16 = vld [vmem:[%s5534_s9 + $0x3a8] sm:$0xff] }
  0xb0   : > { %5062 = vmatmul.mubr.msk.f32.gmra.mxu0 %vm210_vm0, %v2170_v3 }
  0xb1   : > { %5064 = vmatprep.mubr.msk.f32.mxu0 %vm210_vm0, %v2171_v17  ;;  %v3168_v17 = vld [vmem:[%s5534_s9 + $0x3b0] sm:$0xff] }
  0xb4   : > { %5065 = vmatmul.mubr.msk.f32.gmra.mxu0 %vm210_vm0, %v2172_v18 }
  0xb5   : > { %5067 = vmatprep.mubr.msk.f32.mxu0 %vm210_vm0, %v2173_v19  ;;  %v3169_v19 = vld [vmem:[%s5534_s9 + $0x3b8] sm:$0xff] }
  0xb8   : > { %5068 = vmatmul.mubr.msk.f32.gmra.mxu0 %vm210_vm0, %v2174_v20 }
  0xb9   : > { %5070 = vmatprep.mubr.msk.f32.mxu0 %vm210_vm0, %v2175_v21  ;;  %v3170_v21 = vld [vmem:[%s5534_s9 + $0x3c0] sm:$0xff] }
  0xbc   : > { %5071 = vmatmul.mubr.msk.f32.gmra.mxu0 %vm210_vm0, %v2176_v22 }
  0xbd   : > { %5073 = vmatprep.mubr.msk.f32.mxu0 %vm210_vm0, %v2177_v23  ;;  %v3171_v23 = vld [vmem:[%s5534_s9 + $0x3c8] sm:$0xff] }
  0xc0   : > { %5074 = vmatmul.mubr.msk.f32.gmra.mxu0 %vm210_vm0, %v2178_v24 }
  0xc1   : > { %5076 = vmatprep.mubr.msk.f32.mxu0 %vm210_vm0, %v2179_v25  ;;  %v3172_v25 = vld [vmem:[%s5534_s9 + $0x3d0] sm:$0xff] }
  0xc4   : > { %5077 = vmatmul.mubr.msk.f32.gmra.mxu0 %vm210_vm0, %v2180_v26 }
  0xc5   : > { %5079 = vmatprep.mubr.msk.f32.mxu0 %vm210_vm0, %v2181_v27  ;;  %v3173_v27 = vld [vmem:[%s5534_s9 + $0x3d8] sm:$0xff] }
  0xc8   : > { %5080 = vmatmul.mubr.msk.f32.gmra.mxu0 %vm210_vm0, %v2182_v28 }
  0xc9   : > { %5082 = vmatprep.mubr.msk.f32.mxu0 %vm210_vm0, %v2183_v29  ;;  %v3174_v29 = vld [vmem:[%s5534_s9 + $0x3e0] sm:$0xff] }
  0xcc   : > { %5083 = vmatmul.mubr.msk.f32.gmra.mxu0 %vm210_vm0, %v2184_v30 }
  0xcd   : > { %5085 = vmatprep.mubr.msk.f32.mxu0 %vm210_vm0, %v2185_v31  ;;  %v3175_v31 = vld [vmem:[%s5534_s9 + $0x3e8] sm:$0xff] }
  0xd0   : > { %5086 = vmatmul.mubr.msk.f32.gmra.mxu0 %vm210_vm0, %v2186_v32 }
  0xd1   : > { %5088 = vmatprep.mubr.msk.f32.mxu0 %vm210_vm0, %v2187_v33  ;;  %v3176_v33 = vld [vmem:[%s5534_s9 + $0x3f0] sm:$0xff] }
  0xd4   : > { %5089 = vmatmul.mubr.msk.f32.gmra.mxu0 %vm210_vm0, %v2188_v34 }
  0xd5   : > { %5091 = vmatprep.mubr.msk.f32.mxu0 %vm210_vm0, %v2189_v35  ;;  %v3177_v35 = vld [vmem:[%s5534_s9 + $0x3f8] sm:$0xff]  ;;  %s5370_s9 = scalar_lea.vmem %s5976_s30, 1024 }
  0xd6   : > { %p5371_p11 = scmp.ne.s32.totalorder %s5976_s30, %s5370_s9  ;;  %p5378_p1 = scmp.lt.s32.totalorder %s5376_s11, %s5370_s9 }
  0xd8   : > { %5092 = vmatmul.mubr.msk.f32.gmra.mxu0 %vm210_vm0, %v2190_v36  ;;  %p5372_p12 = pnand %p5371_p11, %p5494_p5  ;;  %p5379_p2 = por %p5378_p1, %p5377_p0 }
  0xd9   : > { %5190 = vmatprep.mubr.msk.f32.mxu0 %vm210_vm0, %v3146_v37 }
  0xda   : > { %p5373_p13 = pneg %p5372_p12 }
  0xdc   : > { %v4760_v40 = vpop.f32.mrf.mxu0  ;;  %5191 = vmatmul.mubr.msk.f32.vlgmr.msra.gmra.mxu0 %vm210_vm0, %v3147_v38  ;;  %p5380_p3 = pnand %p5379_p2, %p5373_p13 }
  0xdd   : > { %5193 = vmatprep.mubr.msk.f32.mxu0 %vm210_vm0, %v3148_v39 }
  0xde   : > { %v373_v42 = vpop.f32.mrf.mxu0 }
  0xe0   : > { %v4763_v44 = vpop.f32.mrf.mxu0  ;;  %5194 = vmatmul.mubr.msk.f32.gmra.mxu0 %vm210_vm0, %v3149_v41 }
  0xe1   : > { %4806 = vmatprep.subr.mxu1 %v4763_v44  ;;  %5196 = vmatprep.mubr.msk.f32.mxu0 %vm210_vm0, %v3150_v43 }
  0xe2   : > { %v383_v47 = vpop.f32.mrf.mxu0  ;;  %4807 = vmatpush3.msra.mxu1 %v4763_v44 }
  0xe3   : > { %4808 = vmatprep.subr.mxu1 %v383_v47 }
  0xe4   : > { %v4766_v49 = vpop.f32.mrf.mxu0  ;;  %4809 = vmatpush3.msra.mxu1 %v383_v47  ;;  %5197 = vmatmul.mubr.msk.f32.gmra.mxu0 %vm210_vm0, %v3151_v46 }
  0xe5   : > { %4810 = vmatprep.subr.mxu1 %v4760_v40  ;;  %5199 = vmatprep.mubr.msk.f32.mxu0 %vm210_vm0, %v3152_v48 }
  0xe6   : > { %v393_v51 = vpop.f32.mrf.mxu0  ;;  %4811 = vmatpush3.msra.mxu1 %v4760_v40 }
  0xe7   : > { %4812 = vmatprep.subr.mxu1 %v373_v42 }
  0xe8   : > { %v4769_v54 = vpop.f32.mrf.mxu0  ;;  %4813 = vmatpush3.msra.mxu1 %v373_v42  ;;  %5200 = vmatmul.mubr.msk.f32.gmra.mxu0 %vm210_vm0, %v3153_v50 }
  0xe9   : > { %4815 = vmatmul.mubr.msk.f32.vlgmr.msra.gmra.mxu1 %vm210_vm0, %v5779_v52  ;;  %4817 = vmatprep.subr.mxu1 %v4769_v54 }
  0xea   : > { %v403_v56 = vpop.f32.mrf.mxu0  ;;  %4818 = vmatpush3.msra.mxu1 %v4769_v54  ;;  %5202 = vmatprep.mubr.msk.f32.mxu0 %vm210_vm0, %v3154_v53 }
  0xeb   : > { %4819 = vmatprep.subr.mxu1 %v403_v56  ;;  %4825 = vmatprep.mubr.msk.f32.mxu1 %vm210_vm0, %v5638_v45 }
  0xec   : > { %v4772_v58 = vpop.f32.mrf.mxu0  ;;  %4820 = vmatpush3.msra.mxu1 %v403_v56  ;;  %5203 = vmatmul.mubr.msk.f32.gmra.mxu0 %vm210_vm0, %v3155_v55 }
  0xed   : > { %4821 = vmatprep.subr.mxu1 %v4766_v49  ;;  %5205 = vmatprep.mubr.msk.f32.mxu0 %vm210_vm0, %v3156_v57 }
  0xee   : > { %v413_v60 = vpop.f32.mrf.mxu0  ;;  %4822 = vmatpush3.msra.mxu1 %v4766_v49 }
  0xef   : > { %4823 = vmatprep.subr.mxu1 %v393_v51 }
  0xf0   : > { %v4775_v62 = vpop.f32.mrf.mxu0  ;;  %4824 = vmatpush3.msra.mxu1 %v393_v51  ;;  %5206 = vmatmul.mubr.msk.f32.gmra.mxu0 %vm210_vm0, %v3157_v59 }
  0xf1   : > { %4826 = vmatmul.mubr.msk.f32.vlgmr.msra.gmra.mxu1 %vm210_vm0, %v5779_v52  ;;  %4828 = vmatprep.subr.mxu1 %v4775_v62 }
  0xf2   : > { %v423_v4 = vpop.f32.mrf.mxu0  ;;  %4829 = vmatpush3.msra.mxu1 %v4775_v62  ;;  %5208 = vmatprep.mubr.msk.f32.mxu0 %vm210_vm0, %v3158_v61 }
  0xf3   : > { %4830 = vmatprep.subr.mxu1 %v423_v4  ;;  %4836 = vmatprep.mubr.msk.f32.mxu1 %vm210_vm0, %v5638_v45 }
  0xf4   : > { %v4778_v6 = vpop.f32.mrf.mxu0  ;;  %4831 = vmatpush3.msra.mxu1 %v423_v4  ;;  %5209 = vmatmul.mubr.msk.f32.gmra.mxu0 %vm210_vm0, %v3159_v63 }
  0xf5   : > { %4832 = vmatprep.subr.mxu1 %v4772_v58  ;;  %5211 = vmatprep.mubr.msk.f32.mxu0 %vm210_vm0, %v3160_v5 }
  0xf6   : > { %v433_v8 = vpop.f32.mrf.mxu0  ;;  %4833 = vmatpush3.msra.mxu1 %v4772_v58 }
  0xf7   : > { %4834 = vmatprep.subr.mxu1 %v413_v60 }
  0xf8   : > { %v4781_v10 = vpop.f32.mrf.mxu0  ;;  %4835 = vmatpush3.msra.mxu1 %v413_v60  ;;  %5212 = vmatmul.mubr.msk.f32.gmra.mxu0 %vm210_vm0, %v3161_v7 }
  0xf9   : > { %4837 = vmatmul.mubr.msk.f32.vlgmr.msra.gmra.mxu1 %vm210_vm0, %v5779_v52  ;;  %4839 = vmatprep.subr.mxu1 %v4781_v10 }
  0xfa   : > { %v443_v12 = vpop.f32.mrf.mxu0  ;;  %4840 = vmatpush3.msra.mxu1 %v4781_v10  ;;  %5214 = vmatprep.mubr.msk.f32.mxu0 %vm210_vm0, %v3162_v9 }
  0xfb   : > { %4841 = vmatprep.subr.mxu1 %v443_v12  ;;  %4847 = vmatprep.mubr.msk.f32.mxu1 %vm210_vm0, %v5638_v45 }
  0xfc   : > { %v4784_v0 = vpop.f32.mrf.mxu0  ;;  %4842 = vmatpush3.msra.mxu1 %v443_v12  ;;  %5215 = vmatmul.mubr.msk.f32.gmra.mxu0 %vm210_vm0, %v3163_v11 }
  0xfd   : > { %4843 = vmatprep.subr.mxu1 %v4778_v6  ;;  %5217 = vmatprep.mubr.msk.f32.mxu0 %vm210_vm0, %v3164_v13 }
  0xfe   : > { %v453_v1 = vpop.f32.mrf.mxu0  ;;  %4844 = vmatpush3.msra.mxu1 %v4778_v6 }
  0xff   : > { %4845 = vmatprep.subr.mxu1 %v433_v8 }
 0x100   : > { %v4787_v2 = vpop.f32.mrf.mxu0  ;;  %4846 = vmatpush3.msra.mxu1 %v433_v8  ;;  %5218 = vmatmul.mubr.msk.f32.gmra.mxu0 %vm210_vm0, %v3165_v14 }
 0x101   : > { %4848 = vmatmul.mubr.msk.f32.vlgmr.msra.gmra.mxu1 %vm210_vm0, %v5779_v52  ;;  %4850 = vmatprep.subr.mxu1 %v4787_v2 }
 0x102   : > { %v463_v3 = vpop.f32.mrf.mxu0  ;;  %4851 = vmatpush3.msra.mxu1 %v4787_v2  ;;  %5220 = vmatprep.mubr.msk.f32.mxu0 %vm210_vm0, %v3166_v15 }
 0x103   : > { %4852 = vmatprep.subr.mxu1 %v463_v3  ;;  %4858 = vmatprep.mubr.msk.f32.mxu1 %vm210_vm0, %v5638_v45 }
 0x104   : > { %v4790_v18 = vpop.f32.mrf.mxu0  ;;  %4853 = vmatpush3.msra.mxu1 %v463_v3  ;;  %5221 = vmatmul.mubr.msk.f32.gmra.mxu0 %vm210_vm0, %v3167_v16 }
 0x105   : > { %4854 = vmatprep.subr.mxu1 %v4784_v0  ;;  %5223 = vmatprep.mubr.msk.f32.mxu0 %vm210_vm0, %v3168_v17 }
 0x106   : > { %v473_v20 = vpop.f32.mrf.mxu0  ;;  %4855 = vmatpush3.msra.mxu1 %v4784_v0 }
 0x107   : > { %4856 = vmatprep.subr.mxu1 %v453_v1 }
 0x108   : > { %v4793_v22 = vpop.f32.mrf.mxu0  ;;  %4857 = vmatpush3.msra.mxu1 %v453_v1  ;;  %5224 = vmatmul.mubr.msk.f32.gmra.mxu0 %vm210_vm0, %v3169_v19 }
 0x109   : > { %4859 = vmatmul.mubr.msk.f32.vlgmr.msra.gmra.mxu1 %vm210_vm0, %v5779_v52  ;;  %4861 = vmatprep.subr.mxu1 %v4793_v22 }
 0x10a   : > { %v483_v24 = vpop.f32.mrf.mxu0  ;;  %4862 = vmatpush3.msra.mxu1 %v4793_v22  ;;  %5226 = vmatprep.mubr.msk.f32.mxu0 %vm210_vm0, %v3170_v21 }
 0x10b   : > { %4863 = vmatprep.subr.mxu1 %v483_v24  ;;  %4869 = vmatprep.mubr.msk.f32.mxu1 %vm210_vm0, %v5638_v45 }
 0x10c   : > { %v4796_v26 = vpop.f32.mrf.mxu0  ;;  %4864 = vmatpush3.msra.mxu1 %v483_v24  ;;  %5227 = vmatmul.mubr.msk.f32.gmra.mxu0 %vm210_vm0, %v3171_v23 }
 0x10d   : > { %4865 = vmatprep.subr.mxu1 %v4790_v18  ;;  %5229 = vmatprep.mubr.msk.f32.mxu0 %vm210_vm0, %v3172_v25 }
 0x10e   : > { %v493_v28 = vpop.f32.mrf.mxu0  ;;  %4866 = vmatpush3.msra.mxu1 %v4790_v18 }
 0x10f   : > { %4867 = vmatprep.subr.mxu1 %v473_v20 }
 0x110   : > { %v4799_v30 = vpop.f32.mrf.mxu0  ;;  %4868 = vmatpush3.msra.mxu1 %v473_v20  ;;  %5230 = vmatmul.mubr.msk.f32.gmra.mxu0 %vm210_vm0, %v3173_v27 }
 0x111   : > { %4870 = vmatmul.mubr.msk.f32.vlgmr.msra.gmra.mxu1 %vm210_vm0, %v5779_v52  ;;  %4872 = vmatprep.subr.mxu1 %v4799_v30 }
 0x112   : > { %v503_v32 = vpop.f32.mrf.mxu0  ;;  %4873 = vmatpush3.msra.mxu1 %v4799_v30  ;;  %5232 = vmatprep.mubr.msk.f32.mxu0 %vm210_vm0, %v3174_v29 }
 0x113   : > { %4874 = vmatprep.subr.mxu1 %v503_v32  ;;  %4880 = vmatprep.mubr.msk.f32.mxu1 %vm210_vm0, %v5638_v45 }
 0x114   : > { %v4802_v34 = vpop.f32.mrf.mxu0  ;;  %4875 = vmatpush3.msra.mxu1 %v503_v32  ;;  %5233 = vmatmul.mubr.msk.f32.gmra.mxu0 %vm210_vm0, %v3175_v31 }
 0x115   : > { %4876 = vmatprep.subr.mxu1 %v4796_v26  ;;  %5235 = vmatprep.mubr.msk.f32.mxu0 %vm210_vm0, %v3176_v33 }
 0x116   : > { %v513_v36 = vpop.f32.mrf.mxu0  ;;  %4877 = vmatpush3.msra.mxu1 %v4796_v26 }
 0x117   : > { %4878 = vmatprep.subr.mxu1 %v493_v28 }
 0x118   : > { %v4805_v37 = vpop.f32.mrf.mxu0  ;;  %4879 = vmatpush3.msra.mxu1 %v493_v28  ;;  %5236 = vmatmul.mubr.msk.f32.gmra.mxu0 %vm210_vm0, %v3177_v35 }
 0x119   : > { %4881 = vmatmul.mubr.msk.f32.vlgmr.msra.gmra.mxu1 %vm210_vm0, %v5779_v52  ;;  %4883 = vmatprep.subr.mxu1 %v4805_v37 }
 0x11a   : > { %v523_v38 = vpop.f32.mrf.mxu0  ;;  %4884 = vmatpush3.msra.mxu1 %v4805_v37  ;;  %4891 = vmatprep.mubr.msk.f32.mxu1 %vm210_vm0, %v5638_v45 }
 0x11b   : > { %4885 = vmatprep.subr.mxu1 %v523_v38 }
 0x11c   : > { %4886 = vmatpush3.msra.mxu1 %v523_v38  ;;  %v4904_v39 = vpop.f32.mrf.mxu0 }
 0x11d   : > { %4887 = vmatprep.subr.mxu1 %v4802_v34 }
 0x11e   : > { %4888 = vmatpush3.msra.mxu1 %v4802_v34  ;;  %v1366_v40 = vpop.f32.mrf.mxu0 }
 0x11f   : > { %4889 = vmatprep.subr.mxu1 %v513_v36 }
 0x120   : > { %4890 = vmatpush3.msra.mxu1 %v513_v36  ;;  %v4907_v41 = vpop.f32.mrf.mxu0 }
 0x121   : > { %4892 = vmatmul.mubr.msk.f32.vlgmr.msra.gmra.mxu1 %vm210_vm0, %v5779_v52  ;;  %4950 = vmatprep.subr.mxu1 %v4907_v41 }
 0x122   : > { %v1376_v42 = vpop.f32.mrf.mxu0  ;;  %4951 = vmatpush3.msra.mxu1 %v4907_v41  ;;  %4958 = vmatprep.mubr.msk.f32.mxu1 %vm210_vm0, %v5638_v45  ;;  %v5923_v41 = vld [vmem:[%s6028_s1] sm:$0xff] }
 0x123   : > { %4952 = vmatprep.subr.mxu1 %v1376_v42 }
 0x124   : > { %v4910_v43 = vpop.f32.mrf.mxu0  ;;  %4953 = vmatpush3.msra.mxu1 %v1376_v42 }
 0x125   : > { %4954 = vmatprep.subr.mxu1 %v4904_v39 }
 0x126   : > { %v1386_v44 = vpop.f32.mrf.mxu0  ;;  %4955 = vmatpush3.msra.mxu1 %v4904_v39 }
 0x127   : > { %4956 = vmatprep.subr.mxu1 %v1366_v40 }
 0x128   : > { %v4913_v46 = vpop.f32.mrf.mxu0  ;;  %4957 = vmatpush3.msra.mxu1 %v1366_v40 }
 0x129   : > { %4959 = vmatmul.mubr.msk.f32.vlgmr.msra.gmra.mxu1 %vm210_vm0, %v5779_v52  ;;  %4961 = vmatprep.subr.mxu1 %v4913_v46 }
 0x12a   : > { %v1396_v47 = vpop.f32.mrf.mxu0  ;;  %4962 = vmatpush3.msra.mxu1 %v4913_v46  ;;  %4969 = vmatprep.mubr.msk.f32.mxu1 %vm210_vm0, %v5638_v45 }
 0x12b   : > { %4963 = vmatprep.subr.mxu1 %v1396_v47 }
 0x12c   : > { %v4916_v48 = vpop.f32.mrf.mxu0  ;;  %4964 = vmatpush3.msra.mxu1 %v1396_v47 }
 0x12d   : > { %4965 = vmatprep.subr.mxu1 %v4910_v43 }
 0x12e   : > { %v1406_v49 = vpop.f32.mrf.mxu0  ;;  %4966 = vmatpush3.msra.mxu1 %v4910_v43 }
 0x12f   : > { %4967 = vmatprep.subr.mxu1 %v1386_v44 }
 0x130   : > { %v4919_v50 = vpop.f32.mrf.mxu0  ;;  %4968 = vmatpush3.msra.mxu1 %v1386_v44 }
 0x131   : > { %4970 = vmatmul.mubr.msk.f32.vlgmr.msra.gmra.mxu1 %vm210_vm0, %v5779_v52  ;;  %4972 = vmatprep.subr.mxu1 %v4919_v50 }
 0x132   : > { %v1416_v51 = vpop.f32.mrf.mxu0  ;;  %4973 = vmatpush3.msra.mxu1 %v4919_v50  ;;  %4980 = vmatprep.mubr.msk.f32.mxu1 %vm210_vm0, %v5638_v45 }
 0x133   : > { %4974 = vmatprep.subr.mxu1 %v1416_v51 }
 0x134   : > { %v4922_v53 = vpop.f32.mrf.mxu0  ;;  %4975 = vmatpush3.msra.mxu1 %v1416_v51 }
 0x135   : > { %4976 = vmatprep.subr.mxu1 %v4916_v48 }
 0x136   : > { %v1426_v54 = vpop.f32.mrf.mxu0  ;;  %4977 = vmatpush3.msra.mxu1 %v4916_v48 }
 0x137   : > { %4978 = vmatprep.subr.mxu1 %v1406_v49 }
 0x138   : > { %v4925_v55 = vpop.f32.mrf.mxu0  ;;  %4979 = vmatpush3.msra.mxu1 %v1406_v49 }
 0x139   : > { %4981 = vmatmul.mubr.msk.f32.vlgmr.msra.gmra.mxu1 %vm210_vm0, %v5779_v52  ;;  %4983 = vmatprep.subr.mxu1 %v4925_v55 }
 0x13a   : > { %v1436_v56 = vpop.f32.mrf.mxu0  ;;  %4984 = vmatpush3.msra.mxu1 %v4925_v55  ;;  %4991 = vmatprep.mubr.msk.f32.mxu1 %vm210_vm0, %v5638_v45 }
 0x13b   : > { %4985 = vmatprep.subr.mxu1 %v1436_v56 }
 0x13c   : > { %v4928_v57 = vpop.f32.mrf.mxu0  ;;  %4986 = vmatpush3.msra.mxu1 %v1436_v56 }
 0x13d   : > { %4987 = vmatprep.subr.mxu1 %v4922_v53 }
 0x13e   : > { %v1446_v58 = vpop.f32.mrf.mxu0  ;;  %4988 = vmatpush3.msra.mxu1 %v4922_v53 }
 0x13f   : > { %4989 = vmatprep.subr.mxu1 %v1426_v54 }
 0x140   : > { %v4931_v59 = vpop.f32.mrf.mxu0  ;;  %4990 = vmatpush3.msra.mxu1 %v1426_v54 }
 0x141   : > { %4992 = vmatmul.mubr.msk.f32.vlgmr.msra.gmra.mxu1 %vm210_vm0, %v5779_v52  ;;  %4994 = vmatprep.subr.mxu1 %v4931_v59 }
 0x142   : > { %v1456_v60 = vpop.f32.mrf.mxu0  ;;  %4995 = vmatpush3.msra.mxu1 %v4931_v59  ;;  %5002 = vmatprep.mubr.msk.f32.mxu1 %vm210_vm0, %v5638_v45 }
 0x143   : > { %4996 = vmatprep.subr.mxu1 %v1456_v60 }
 0x144   : > { %v4934_v61 = vpop.f32.mrf.mxu0  ;;  %4997 = vmatpush3.msra.mxu1 %v1456_v60 }
 0x145   : > { %4998 = vmatprep.subr.mxu1 %v4928_v57 }
 0x146   : > { %v1466_v62 = vpop.f32.mrf.mxu0  ;;  %4999 = vmatpush3.msra.mxu1 %v4928_v57 }
 0x147   : > { %5000 = vmatprep.subr.mxu1 %v1446_v58 }
 0x148   : > { %v4937_v63 = vpop.f32.mrf.mxu0  ;;  %5001 = vmatpush3.msra.mxu1 %v1446_v58 }
 0x149   : > { %5003 = vmatmul.mubr.msk.f32.vlgmr.msra.gmra.mxu1 %vm210_vm0, %v5779_v52  ;;  %5005 = vmatprep.subr.mxu1 %v4937_v63 }
 0x14a   : > { %v1476_v4 = vpop.f32.mrf.mxu0  ;;  %5006 = vmatpush3.msra.mxu1 %v4937_v63  ;;  %5013 = vmatprep.mubr.msk.f32.mxu1 %vm210_vm0, %v5638_v45 }
 0x14b   : > { %5007 = vmatprep.subr.mxu1 %v1476_v4 }
 0x14c   : > { %v4940_v5 = vpop.f32.mrf.mxu0  ;;  %5008 = vmatpush3.msra.mxu1 %v1476_v4 }
 0x14d   : > { %5009 = vmatprep.subr.mxu1 %v4934_v61 }
 0x14e   : > { %v1486_v6 = vpop.f32.mrf.mxu0  ;;  %5010 = vmatpush3.msra.mxu1 %v4934_v61 }
 0x14f   : > { %5011 = vmatprep.subr.mxu1 %v1466_v62 }
 0x150   : > { %v4943_v7 = vpop.f32.mrf.mxu0  ;;  %5012 = vmatpush3.msra.mxu1 %v1466_v62 }
 0x151   : > { %5014 = vmatmul.mubr.msk.f32.vlgmr.msra.gmra.mxu1 %vm210_vm0, %v5779_v52  ;;  %5016 = vmatprep.subr.mxu1 %v4943_v7 }
 0x152   : > { %v1496_v8 = vpop.f32.mrf.mxu0  ;;  %5017 = vmatpush3.msra.mxu1 %v4943_v7  ;;  %5024 = vmatprep.mubr.msk.f32.mxu1 %vm210_vm0, %v5638_v45 }
 0x153   : > { %5018 = vmatprep.subr.mxu1 %v1496_v8 }
 0x154   : > { %v4946_v9 = vpop.f32.mrf.mxu0  ;;  %5019 = vmatpush3.msra.mxu1 %v1496_v8 }
 0x155   : > { %5020 = vmatprep.subr.mxu1 %v4940_v5 }
 0x156   : > { %v1506_v10 = vpop.f32.mrf.mxu0  ;;  %5021 = vmatpush3.msra.mxu1 %v4940_v5 }
 0x157   : > { %5022 = vmatprep.subr.mxu1 %v1486_v6 }
 0x158   : > { %v4949_v11 = vpop.f32.mrf.mxu0  ;;  %5023 = vmatpush3.msra.mxu1 %v1486_v6 }
 0x159   : > { %5025 = vmatmul.mubr.msk.f32.vlgmr.msra.gmra.mxu1 %vm210_vm0, %v5779_v52  ;;  %5027 = vmatprep.subr.mxu1 %v4949_v11 }
 0x15a   : > { %v1516_v12 = vpop.f32.mrf.mxu0  ;;  %5028 = vmatpush3.msra.mxu1 %v4949_v11  ;;  %5035 = vmatprep.mubr.msk.f32.mxu1 %vm210_vm0, %v5638_v45 }
 0x15b   : > { %5029 = vmatprep.subr.mxu1 %v1516_v12 }
 0x15c   : > { %5030 = vmatpush3.msra.mxu1 %v1516_v12  ;;  %v5048_v13 = vpop.f32.mrf.mxu0 }
 0x15d   : > { %5031 = vmatprep.subr.mxu1 %v4946_v9 }
 0x15e   : > { %5032 = vmatpush3.msra.mxu1 %v4946_v9  ;;  %v2353_v0 = vpop.f32.mrf.mxu0 }
 0x15f   : > { %5033 = vmatprep.subr.mxu1 %v1506_v10 }
 0x160   : > { %5034 = vmatpush3.msra.mxu1 %v1506_v10  ;;  %v5051_v14 = vpop.f32.mrf.mxu0 }
 0x161   : > { %5036 = vmatmul.mubr.msk.f32.vlgmr.msra.gmra.mxu1 %vm210_vm0, %v5779_v52  ;;  %5094 = vmatprep.subr.mxu1 %v5051_v14 }
 0x162   : > { %v2363_v1 = vpop.f32.mrf.mxu0  ;;  %5095 = vmatpush3.msra.mxu1 %v5051_v14  ;;  %5102 = vmatprep.mubr.msk.f32.mxu1 %vm210_vm0, %v5638_v45 }
 0x163   : > { %5096 = vmatprep.subr.mxu1 %v2363_v1 }
 0x164   : > { %v5054_v15 = vpop.f32.mrf.mxu0  ;;  %5097 = vmatpush3.msra.mxu1 %v2363_v1 }
 0x165   : > { %5098 = vmatprep.subr.mxu1 %v5048_v13 }
 0x166   : > { %v2373_v2 = vpop.f32.mrf.mxu0  ;;  %5099 = vmatpush3.msra.mxu1 %v5048_v13 }
 0x167   : > { %5100 = vmatprep.subr.mxu1 %v2353_v0 }
 0x168   : > { %v5057_v16 = vpop.f32.mrf.mxu0  ;;  %5101 = vmatpush3.msra.mxu1 %v2353_v0 }
 0x169   : > { %5103 = vmatmul.mubr.msk.f32.vlgmr.msra.gmra.mxu1 %vm210_vm0, %v5779_v52  ;;  %5105 = vmatprep.subr.mxu1 %v5057_v16 }
 0x16a   : > { %v2383_v3 = vpop.f32.mrf.mxu0  ;;  %5106 = vmatpush3.msra.mxu1 %v5057_v16  ;;  %5113 = vmatprep.mubr.msk.f32.mxu1 %vm210_vm0, %v5638_v45 }
 0x16b   : > { %5107 = vmatprep.subr.mxu1 %v2383_v3 }
 0x16c   : > { %v5060_v17 = vpop.f32.mrf.mxu0  ;;  %5108 = vmatpush3.msra.mxu1 %v2383_v3 }
 0x16d   : > { %5109 = vmatprep.subr.mxu1 %v5054_v15 }
 0x16e   : > { %v2393_v18 = vpop.f32.mrf.mxu0  ;;  %5110 = vmatpush3.msra.mxu1 %v5054_v15 }
 0x16f   : > { %5111 = vmatprep.subr.mxu1 %v2373_v2 }
 0x170   : > { %v5063_v19 = vpop.f32.mrf.mxu0  ;;  %5112 = vmatpush3.msra.mxu1 %v2373_v2 }
 0x171   : > { %5114 = vmatmul.mubr.msk.f32.vlgmr.msra.gmra.mxu1 %vm210_vm0, %v5779_v52  ;;  %5116 = vmatprep.subr.mxu1 %v5063_v19 }
 0x172   : > { %v2403_v20 = vpop.f32.mrf.mxu0  ;;  %5117 = vmatpush3.msra.mxu1 %v5063_v19  ;;  %5124 = vmatprep.mubr.msk.f32.mxu1 %vm210_vm0, %v5638_v45 }
 0x173   : > { %5118 = vmatprep.subr.mxu1 %v2403_v20 }
 0x174   : > { %v5066_v21 = vpop.f32.mrf.mxu0  ;;  %5119 = vmatpush3.msra.mxu1 %v2403_v20 }
 0x175   : > { %5120 = vmatprep.subr.mxu1 %v5060_v17 }
 0x176   : > { %v2413_v22 = vpop.f32.mrf.mxu0  ;;  %5121 = vmatpush3.msra.mxu1 %v5060_v17 }
 0x177   : > { %5122 = vmatprep.subr.mxu1 %v2393_v18 }
 0x178   : > { %v5069_v23 = vpop.f32.mrf.mxu0  ;;  %5123 = vmatpush3.msra.mxu1 %v2393_v18 }
 0x179   : > { %5125 = vmatmul.mubr.msk.f32.vlgmr.msra.gmra.mxu1 %vm210_vm0, %v5779_v52  ;;  %5127 = vmatprep.subr.mxu1 %v5069_v23 }
 0x17a   : > { %v2423_v24 = vpop.f32.mrf.mxu0  ;;  %5128 = vmatpush3.msra.mxu1 %v5069_v23  ;;  %5135 = vmatprep.mubr.msk.f32.mxu1 %vm210_vm0, %v5638_v45 }
 0x17b   : > { %5129 = vmatprep.subr.mxu1 %v2423_v24 }
 0x17c   : > { %v5072_v25 = vpop.f32.mrf.mxu0  ;;  %5130 = vmatpush3.msra.mxu1 %v2423_v24 }
 0x17d   : > { %5131 = vmatprep.subr.mxu1 %v5066_v21 }
 0x17e   : > { %v2433_v26 = vpop.f32.mrf.mxu0  ;;  %5132 = vmatpush3.msra.mxu1 %v5066_v21 }
 0x17f   : > { %5133 = vmatprep.subr.mxu1 %v2413_v22 }
 0x180   : > { %v5075_v27 = vpop.f32.mrf.mxu0  ;;  %5134 = vmatpush3.msra.mxu1 %v2413_v22 }
 0x181   : > { %5136 = vmatmul.mubr.msk.f32.vlgmr.msra.gmra.mxu1 %vm210_vm0, %v5779_v52  ;;  %5138 = vmatprep.subr.mxu1 %v5075_v27 }
 0x182   : > { %v2443_v28 = vpop.f32.mrf.mxu0  ;;  %5139 = vmatpush3.msra.mxu1 %v5075_v27  ;;  %5146 = vmatprep.mubr.msk.f32.mxu1 %vm210_vm0, %v5638_v45 }
 0x183   : > { %5140 = vmatprep.subr.mxu1 %v2443_v28 }
 0x184   : > { %v5078_v29 = vpop.f32.mrf.mxu0  ;;  %5141 = vmatpush3.msra.mxu1 %v2443_v28 }
 0x185   : > { %5142 = vmatprep.subr.mxu1 %v5072_v25 }
 0x186   : > { %v2453_v30 = vpop.f32.mrf.mxu0  ;;  %5143 = vmatpush3.msra.mxu1 %v5072_v25 }
 0x187   : > { %5144 = vmatprep.subr.mxu1 %v2433_v26 }
 0x188   : > { %v5081_v31 = vpop.f32.mrf.mxu0  ;;  %5145 = vmatpush3.msra.mxu1 %v2433_v26 }
 0x189   : > { %5147 = vmatmul.mubr.msk.f32.vlgmr.msra.gmra.mxu1 %vm210_vm0, %v5779_v52  ;;  %5149 = vmatprep.subr.mxu1 %v5081_v31 }
 0x18a   : > { %v2463_v32 = vpop.f32.mrf.mxu0  ;;  %5150 = vmatpush3.msra.mxu1 %v5081_v31  ;;  %5157 = vmatprep.mubr.msk.f32.mxu1 %vm210_vm0, %v5638_v45 }
 0x18b   : > { %5151 = vmatprep.subr.mxu1 %v2463_v32 }
 0x18c   : > { %v5084_v33 = vpop.f32.mrf.mxu0  ;;  %5152 = vmatpush3.msra.mxu1 %v2463_v32 }
 0x18d   : > { %5153 = vmatprep.subr.mxu1 %v5078_v29 }
 0x18e   : > { %v2473_v34 = vpop.f32.mrf.mxu0  ;;  %5154 = vmatpush3.msra.mxu1 %v5078_v29 }
 0x18f   : > { %5155 = vmatprep.subr.mxu1 %v2453_v30 }
 0x190   : > { %v5087_v35 = vpop.f32.mrf.mxu0  ;;  %5156 = vmatpush3.msra.mxu1 %v2453_v30 }
 0x191   : > { %5158 = vmatmul.mubr.msk.f32.vlgmr.msra.gmra.mxu1 %vm210_vm0, %v5779_v52  ;;  %5160 = vmatprep.subr.mxu1 %v5087_v35 }
 0x192   : > { %v2483_v36 = vpop.f32.mrf.mxu0  ;;  %5161 = vmatpush3.msra.mxu1 %v5087_v35  ;;  %5168 = vmatprep.mubr.msk.f32.mxu1 %vm210_vm0, %v5638_v45 }
 0x193   : > { %5162 = vmatprep.subr.mxu1 %v2483_v36 }
 0x194   : > { %v5090_v37 = vpop.f32.mrf.mxu0  ;;  %5163 = vmatpush3.msra.mxu1 %v2483_v36 }
 0x195   : > { %5164 = vmatprep.subr.mxu1 %v5084_v33 }
 0x196   : > { %v2493_v38 = vpop.f32.mrf.mxu0  ;;  %5165 = vmatpush3.msra.mxu1 %v5084_v33 }
 0x197   : > { %5166 = vmatprep.subr.mxu1 %v2473_v34 }
 0x198   : > { %v5093_v39 = vpop.f32.mrf.mxu0  ;;  %5167 = vmatpush3.msra.mxu1 %v2473_v34 }
 0x199   : > { %5169 = vmatmul.mubr.msk.f32.vlgmr.msra.gmra.mxu1 %vm210_vm0, %v5779_v52  ;;  %5171 = vmatprep.subr.mxu1 %v5093_v39 }
 0x19a   : > { %v2503_v40 = vpop.f32.mrf.mxu0  ;;  %5172 = vmatpush3.msra.mxu1 %v5093_v39  ;;  %5179 = vmatprep.mubr.msk.f32.mxu1 %vm210_vm0, %v5923_v41 }
 0x19b   : > { %5173 = vmatprep.subr.mxu1 %v2503_v40 }
 0x19c   : > { %5174 = vmatpush3.msra.mxu1 %v2503_v40  ;;  %v5192_v45 = vpop.f32.mrf.mxu0 }
 0x19d   : > { %5175 = vmatprep.subr.mxu1 %v5090_v37 }
 0x19e   : > { %5176 = vmatpush3.msra.mxu1 %v5090_v37  ;;  %v3340_v42 = vpop.f32.mrf.mxu0 }
 0x19f   : > { %5177 = vmatprep.subr.mxu1 %v2493_v38 }
 0x1a0   : > { %5178 = vmatpush3.msra.mxu1 %v2493_v38  ;;  %v5195_v43 = vpop.f32.mrf.mxu0 }
 0x1a1   : > { %5180 = vmatmul.mubr.msk.f32.vlgmr.msra.gmra.mxu1 %vm210_vm0, %v5779_v52  ;;  %5238 = vmatprep.subr.mxu1 %v5195_v43 }
 0x1a2   : > { %v3350_v44 = vpop.f32.mrf.mxu0  ;;  %5239 = vmatpush3.msra.mxu1 %v5195_v43  ;;  %5246 = vmatprep.mubr.msk.f32.mxu1 %vm210_vm0, %v5923_v41 }
 0x1a3   : > { %5240 = vmatprep.subr.mxu1 %v3350_v44 }
 0x1a4   : > { %v5198_v46 = vpop.f32.mrf.mxu0  ;;  %5241 = vmatpush3.msra.mxu1 %v3350_v44 }
 0x1a5   : > { %5242 = vmatprep.subr.mxu1 %v5192_v45 }
 0x1a6   : > { %v3360_v47 = vpop.f32.mrf.mxu0  ;;  %5243 = vmatpush3.msra.mxu1 %v5192_v45 }
 0x1a7   : > { %5244 = vmatprep.subr.mxu1 %v3340_v42 }
 0x1a8   : > { %v5201_v48 = vpop.f32.mrf.mxu0  ;;  %5245 = vmatpush3.msra.mxu1 %v3340_v42 }
 0x1a9   : > { %v4816_v49 = vpop.f32.mrf.mxu1  ;;  %5247 = vmatmul.mubr.msk.f32.vlgmr.msra.gmra.mxu1 %vm210_vm0, %v5779_v52  ;;  %5249 = vmatprep.subr.mxu1 %v5201_v48 }
 0x1aa   : > { %v3370_v50 = vpop.f32.mrf.mxu0  ;;  %5250 = vmatpush3.msra.mxu1 %v5201_v48  ;;  %5257 = vmatprep.mubr.msk.f32.mxu1 %vm210_vm0, %v5923_v41 }
 0x1ab   : > { %v604_v51 = vpop.f32.mrf.mxu1  ;;  %5251 = vmatprep.subr.mxu1 %v3370_v50 }
 0x1ac   : > { %1138 = vxpose.xlu0.b32.start [1/16] (narrow) %v604_v51, 16  ;;  %v5204_v53 = vpop.f32.mrf.mxu0  ;;  %5252 = vmatpush3.msra.mxu1 %v3370_v50 }
 0x1ad   : > { %5253 = vmatprep.subr.mxu1 %v5198_v46 }
 0x1ae   : > { %v3380_v54 = vpop.f32.mrf.mxu0  ;;  %5254 = vmatpush3.msra.mxu1 %v5198_v46 }
 0x1af   : > { %5255 = vmatprep.subr.mxu1 %v3360_v47 }
 0x1b0   : > { %1139 = vxpose.xlu0.b32.cont [2/16] (narrow) %v4816_v49, 16  ;;  %v5207_v55 = vpop.f32.mrf.mxu0  ;;  %5256 = vmatpush3.msra.mxu1 %v3360_v47 }
 0x1b1   : > { %v4827_v56 = vpop.f32.mrf.mxu1  ;;  %5258 = vmatmul.mubr.msk.f32.vlgmr.msra.gmra.mxu1 %vm210_vm0, %v5779_v52  ;;  %5260 = vmatprep.subr.mxu1 %v5207_v55 }
 0x1b2   : > { %v3390_v57 = vpop.f32.mrf.mxu0  ;;  %5261 = vmatpush3.msra.mxu1 %v5207_v55  ;;  %5268 = vmatprep.mubr.msk.f32.mxu1 %vm210_vm0, %v5923_v41 }
 0x1b3   : > { %v679_v58 = vpop.f32.mrf.mxu1  ;;  %5262 = vmatprep.subr.mxu1 %v3390_v57 }
 0x1b4   : > { %1140 = vxpose.xlu0.b32.cont [3/16] (narrow) %v679_v58, 16  ;;  %v5210_v59 = vpop.f32.mrf.mxu0  ;;  %5263 = vmatpush3.msra.mxu1 %v3390_v57 }
 0x1b5   : > { %5264 = vmatprep.subr.mxu1 %v5204_v53 }
 0x1b6   : > { %v3400_v60 = vpop.f32.mrf.mxu0  ;;  %5265 = vmatpush3.msra.mxu1 %v5204_v53 }
 0x1b7   : > { %5266 = vmatprep.subr.mxu1 %v3380_v54 }
 0x1b8   : > { %1141 = vxpose.xlu0.b32.cont [4/16] (narrow) %v4827_v56, 16  ;;  %v5213_v61 = vpop.f32.mrf.mxu0  ;;  %5267 = vmatpush3.msra.mxu1 %v3380_v54 }
 0x1b9   : > { %v4838_v62 = vpop.f32.mrf.mxu1  ;;  %5269 = vmatmul.mubr.msk.f32.vlgmr.msra.gmra.mxu1 %vm210_vm0, %v5779_v52  ;;  %5271 = vmatprep.subr.mxu1 %v5213_v61 }
 0x1ba   : > { %v3410_v63 = vpop.f32.mrf.mxu0  ;;  %5272 = vmatpush3.msra.mxu1 %v5213_v61  ;;  %5279 = vmatprep.mubr.msk.f32.mxu1 %vm210_vm0, %v5923_v41 }
 0x1bb   : > { %v754_v4 = vpop.f32.mrf.mxu1  ;;  %5273 = vmatprep.subr.mxu1 %v3410_v63 }
 0x1bc   : > { %1142 = vxpose.xlu0.b32.cont [5/16] (narrow) %v754_v4, 16  ;;  %v5216_v5 = vpop.f32.mrf.mxu0  ;;  %5274 = vmatpush3.msra.mxu1 %v3410_v63 }
 0x1bd   : > { %5275 = vmatprep.subr.mxu1 %v5210_v59 }
 0x1be   : > { %v3420_v6 = vpop.f32.mrf.mxu0  ;;  %5276 = vmatpush3.msra.mxu1 %v5210_v59 }
 0x1bf   : > { %5277 = vmatprep.subr.mxu1 %v3400_v60 }
 0x1c0   : > { %1143 = vxpose.xlu0.b32.cont [6/16] (narrow) %v4838_v62, 16  ;;  %v5219_v7 = vpop.f32.mrf.mxu0  ;;  %5278 = vmatpush3.msra.mxu1 %v3400_v60 }
 0x1c1   : > { %v4849_v8 = vpop.f32.mrf.mxu1  ;;  %5280 = vmatmul.mubr.msk.f32.vlgmr.msra.gmra.mxu1 %vm210_vm0, %v5779_v52  ;;  %5282 = vmatprep.subr.mxu1 %v5219_v7 }
 0x1c2   : > { %v3430_v9 = vpop.f32.mrf.mxu0  ;;  %5283 = vmatpush3.msra.mxu1 %v5219_v7  ;;  %5290 = vmatprep.mubr.msk.f32.mxu1 %vm210_vm0, %v5923_v41 }
 0x1c3   : > { %v829_v10 = vpop.f32.mrf.mxu1  ;;  %5284 = vmatprep.subr.mxu1 %v3430_v9 }
 0x1c4   : > { %1144 = vxpose.xlu0.b32.cont [7/16] (narrow) %v829_v10, 16  ;;  %v5222_v11 = vpop.f32.mrf.mxu0  ;;  %5285 = vmatpush3.msra.mxu1 %v3430_v9 }
 0x1c5   : > { %5286 = vmatprep.subr.mxu1 %v5216_v5 }
 0x1c6   : > { %v3440_v12 = vpop.f32.mrf.mxu0  ;;  %5287 = vmatpush3.msra.mxu1 %v5216_v5 }
 0x1c7   : > { %5288 = vmatprep.subr.mxu1 %v3420_v6 }
 0x1c8   : > { %1145 = vxpose.xlu0.b32.cont [8/16] (narrow) %v4849_v8, 16  ;;  %v5225_v13 = vpop.f32.mrf.mxu0  ;;  %5289 = vmatpush3.msra.mxu1 %v3420_v6 }
 0x1c9   : > { %v4860_v0 = vpop.f32.mrf.mxu1  ;;  %5291 = vmatmul.mubr.msk.f32.vlgmr.msra.gmra.mxu1 %vm210_vm0, %v5779_v52  ;;  %5293 = vmatprep.subr.mxu1 %v5225_v13 }
 0x1ca   : > { %v3450_v14 = vpop.f32.mrf.mxu0  ;;  %5294 = vmatpush3.msra.mxu1 %v5225_v13  ;;  %5301 = vmatprep.mubr.msk.f32.mxu1 %vm210_vm0, %v5923_v41 }
 0x1cb   : > { %v904_v1 = vpop.f32.mrf.mxu1  ;;  %5295 = vmatprep.subr.mxu1 %v3450_v14 }
 0x1cc   : > { %1146 = vxpose.xlu0.b32.cont [9/16] (narrow) %v904_v1, 16  ;;  %v5228_v15 = vpop.f32.mrf.mxu0  ;;  %5296 = vmatpush3.msra.mxu1 %v3450_v14 }
 0x1cd   : > { %5297 = vmatprep.subr.mxu1 %v5222_v11 }
 0x1ce   : > { %v3460_v2 = vpop.f32.mrf.mxu0  ;;  %5298 = vmatpush3.msra.mxu1 %v5222_v11 }
 0x1cf   : > { %5299 = vmatprep.subr.mxu1 %v3440_v12 }
 0x1d0   : > { %1147 = vxpose.xlu0.b32.cont [10/16] (narrow) %v4860_v0, 16  ;;  %v5231_v16 = vpop.f32.mrf.mxu0  ;;  %5300 = vmatpush3.msra.mxu1 %v3440_v12 }
 0x1d1   : > { %v4871_v3 = vpop.f32.mrf.mxu1  ;;  %5302 = vmatmul.mubr.msk.f32.vlgmr.msra.gmra.mxu1 %vm210_vm0, %v5779_v52  ;;  %5304 = vmatprep.subr.mxu1 %v5231_v16 }
 0x1d2   : > { %v3470_v17 = vpop.f32.mrf.mxu0  ;;  %5305 = vmatpush3.msra.mxu1 %v5231_v16  ;;  %5312 = vmatprep.mubr.msk.f32.mxu1 %vm210_vm0, %v5923_v41 }
 0x1d3   : > { %v979_v18 = vpop.f32.mrf.mxu1  ;;  %5306 = vmatprep.subr.mxu1 %v3470_v17 }
 0x1d4   : > { %1148 = vxpose.xlu0.b32.cont [11/16] (narrow) %v979_v18, 16  ;;  %v5234_v19 = vpop.f32.mrf.mxu0  ;;  %5307 = vmatpush3.msra.mxu1 %v3470_v17 }
 0x1d5   : > { %5308 = vmatprep.subr.mxu1 %v5228_v15 }
 0x1d6   : > { %v3480_v20 = vpop.f32.mrf.mxu0  ;;  %5309 = vmatpush3.msra.mxu1 %v5228_v15 }
 0x1d7   : > { %5310 = vmatprep.subr.mxu1 %v3460_v2 }
 0x1d8   : > { %1149 = vxpose.xlu0.b32.cont [12/16] (narrow) %v4871_v3, 16  ;;  %v5237_v21 = vpop.f32.mrf.mxu0  ;;  %5311 = vmatpush3.msra.mxu1 %v3460_v2 }
 0x1d9   : > { %v4882_v22 = vpop.f32.mrf.mxu1  ;;  %5313 = vmatmul.mubr.msk.f32.vlgmr.msra.gmra.mxu1 %vm210_vm0, %v5779_v52  ;;  %5315 = vmatprep.subr.mxu1 %v5237_v21  ;;  %v5369_v52 = vld [vmem:[%s6028_s1 + $0x8] sm:$0xff] }
 0x1da   : > { %v3490_v23 = vpop.f32.mrf.mxu0  ;;  %5316 = vmatpush3.msra.mxu1 %v5237_v21  ;;  %5323 = vmatprep.mubr.msk.f32.mxu1 %vm210_vm0, %v5923_v41 }
 0x1db   : > { %v1054_v24 = vpop.f32.mrf.mxu1  ;;  %5317 = vmatprep.subr.mxu1 %v3490_v23 }
 0x1dc   : > { %1150 = vxpose.xlu0.b32.cont [13/16] (narrow) %v1054_v24, 16  ;;  %5318 = vmatpush3.msra.mxu1 %v3490_v23 }
 0x1dd   : > { %5319 = vmatprep.subr.mxu1 %v5234_v19 }
 0x1de   : > { %5320 = vmatpush3.msra.mxu1 %v5234_v19 }
 0x1df   : > { %5321 = vmatprep.subr.mxu1 %v3480_v20 }
 0x1e0   : > { %1151 = vxpose.xlu0.b32.cont [14/16] (narrow) %v4882_v22, 16  ;;  %5322 = vmatpush3.msra.mxu1 %v3480_v20 }
 0x1e1   : > { %v4893_v25 = vpop.f32.mrf.mxu1  ;;  %5324 = vmatmul.mubr.msk.f32.vlgmr.msra.gmra.mxu1 %vm210_vm0, %v5369_v52 }
 0x1e3   : > { %v1129_v26 = vpop.f32.mrf.mxu1 }
 0x1e4   : > { %1152 = vxpose.xlu0.b32.cont [15/16] (narrow) %v1129_v26, 16 }
 0x1e8   : > { %1153 = vxpose.xlu0.b32.end [16/16] (narrow) %v4893_v25, 16 }
 0x1e9   : > { %v4960_v27 = vpop.f32.mrf.mxu1 }
 0x1eb   : > { %v1591_v28 = vpop.f32.mrf.mxu1 }
 0x1ec   : > { %2125 = vxpose.xlu1.b32.start [1/16] (narrow) %v1591_v28, 16 }
 0x1f0   : > { %2126 = vxpose.xlu1.b32.cont [2/16] (narrow) %v4960_v27, 16 }
 0x1f1   : > { %v4971_v29 = vpop.f32.mrf.mxu1 }
 0x1f3   : > { %v1666_v30 = vpop.f32.mrf.mxu1 }
 0x1f4   : > { %2127 = vxpose.xlu1.b32.cont [3/16] (narrow) %v1666_v30, 16 }
 0x1f8   : > { %2128 = vxpose.xlu1.b32.cont [4/16] (narrow) %v4971_v29, 16 }
 0x1f9   : > { %v4982_v31 = vpop.f32.mrf.mxu1 }
 0x1fb   : > { %v1741_v32 = vpop.f32.mrf.mxu1 }
 0x1fc   : > { %2129 = vxpose.xlu1.b32.cont [5/16] (narrow) %v1741_v32, 16 }
 0x200   : > { %2130 = vxpose.xlu1.b32.cont [6/16] (narrow) %v4982_v31, 16 }
 0x201   : > { %v4993_v33 = vpop.f32.mrf.mxu1 }
 0x203   : > { %v1816_v34 = vpop.f32.mrf.mxu1 }
 0x204   : > { %2131 = vxpose.xlu1.b32.cont [7/16] (narrow) %v1816_v34, 16 }
 0x208   : > { %2132 = vxpose.xlu1.b32.cont [8/16] (narrow) %v4993_v33, 16 }
 0x209   : > { %v5004_v35 = vpop.f32.mrf.mxu1 }
 0x20b   : > { %v1891_v36 = vpop.f32.mrf.mxu1 }
 0x20c   : > { %2133 = vxpose.xlu1.b32.cont [9/16] (narrow) %v1891_v36, 16 }
 0x210   : > { %2134 = vxpose.xlu1.b32.cont [10/16] (narrow) %v5004_v35, 16 }
 0x211   : > { %v5015_v37 = vpop.f32.mrf.mxu1 }
 0x213   : > { %v1966_v38 = vpop.f32.mrf.mxu1 }
 0x214   : > { %2135 = vxpose.xlu1.b32.cont [11/16] (narrow) %v1966_v38, 16 }
 0x218   : > { %2136 = vxpose.xlu1.b32.cont [12/16] (narrow) %v5015_v37, 16 }
 0x219   : > { %v5026_v39 = vpop.f32.mrf.mxu1 }
 0x21b   : > { %v2041_v40 = vpop.f32.mrf.mxu1 }
 0x21c   : > { %2137 = vxpose.xlu1.b32.cont [13/16] (narrow) %v2041_v40, 16 }
 0x220   : > { %2138 = vxpose.xlu1.b32.cont [14/16] (narrow) %v5026_v39, 16 }
 0x221   : > { %v5037_v41 = vpop.f32.mrf.mxu1 }
 0x223   : > { %v2116_v45 = vpop.f32.mrf.mxu1 }
 0x224   : > { %2139 = vxpose.xlu1.b32.cont [15/16] (narrow) %v2116_v45, 16 }
 0x228   : > { %2140 = vxpose.xlu1.b32.end [16/16] (narrow) %v5037_v41, 16  ;;  %v1154_v42 = vpop.trf.xlu0 }
 0x229   : > { %v5104_v43 = vpop.f32.mrf.mxu1  ;;  %1170 = vst [vmem:[%s5966_s29] sm:$0xff] %v1154_v42 }
 0x22b   : > { %v2578_v44 = vpop.f32.mrf.mxu1 }
 0x22c   : > { %3112 = vxpose.xlu0.b32.start [1/16] (narrow) %v2578_v44, 16  ;;  %v1155_v46 = vpop.trf.xlu0 }
 0x22d   : > { %1171 = vst [vmem:[%s5966_s29 + $0x20] sm:$0xff] %v1155_v46 }
 0x230   : > { %3113 = vxpose.xlu0.b32.cont [2/16] (narrow) %v5104_v43, 16 }
 0x231   : > { %v5115_v47 = vpop.f32.mrf.mxu1 }
 0x233   : > { %v2653_v48 = vpop.f32.mrf.mxu1 }
 0x234   : > { %3114 = vxpose.xlu0.b32.cont [3/16] (narrow) %v2653_v48, 16 }
 0x238   : > { %3115 = vxpose.xlu0.b32.cont [4/16] (narrow) %v5115_v47, 16 }
 0x239   : > { %v5126_v49 = vpop.f32.mrf.mxu1 }
 0x23b   : > { %v2728_v50 = vpop.f32.mrf.mxu1 }
 0x23c   : > { %3116 = vxpose.xlu0.b32.cont [5/16] (narrow) %v2728_v50, 16 }
 0x240   : > { %3117 = vxpose.xlu0.b32.cont [6/16] (narrow) %v5126_v49, 16 }
 0x241   : > { %v5137_v51 = vpop.f32.mrf.mxu1 }
 0x243   : > { %v2803_v53 = vpop.f32.mrf.mxu1 }
 0x244   : > { %3118 = vxpose.xlu0.b32.cont [7/16] (narrow) %v2803_v53, 16 }
 0x248   : > { %3119 = vxpose.xlu0.b32.cont [8/16] (narrow) %v5137_v51, 16 }
 0x249   : > { %v5148_v54 = vpop.f32.mrf.mxu1 }
 0x24b   : > { %v2878_v55 = vpop.f32.mrf.mxu1 }
 0x24c   : > { %3120 = vxpose.xlu0.b32.cont [9/16] (narrow) %v2878_v55, 16 }
 0x250   : > { %3121 = vxpose.xlu0.b32.cont [10/16] (narrow) %v5148_v54, 16 }
 0x251   : > { %v5159_v56 = vpop.f32.mrf.mxu1 }
 0x253   : > { %v2953_v57 = vpop.f32.mrf.mxu1 }
 0x254   : > { %3122 = vxpose.xlu0.b32.cont [11/16] (narrow) %v2953_v57, 16 }
 0x258   : > { %3123 = vxpose.xlu0.b32.cont [12/16] (narrow) %v5159_v56, 16 }
 0x259   : > { %v5170_v58 = vpop.f32.mrf.mxu1 }
 0x25b   : > { %v3028_v59 = vpop.f32.mrf.mxu1 }
 0x25c   : > { %3124 = vxpose.xlu0.b32.cont [13/16] (narrow) %v3028_v59, 16 }
 0x260   : > { %3125 = vxpose.xlu0.b32.cont [14/16] (narrow) %v5170_v58, 16 }
 0x261   : > { %v5181_v60 = vpop.f32.mrf.mxu1 }
 0x263   : > { %v3103_v61 = vpop.f32.mrf.mxu1 }
 0x264   : > { %3126 = vxpose.xlu0.b32.cont [15/16] (narrow) %v3103_v61, 16 }
 0x268   : > { %3127 = vxpose.xlu0.b32.end [16/16] (narrow) %v5181_v60, 16  ;;  %v2141_v62 = vpop.trf.xlu1 }
 0x269   : > { %v5248_v63 = vpop.f32.mrf.mxu1  ;;  %2157 = vst [vmem:[%s5966_s29 + $0x8] sm:$0xff] %v2141_v62 }
 0x26b   : > { %v3565_v4 = vpop.f32.mrf.mxu1 }
 0x26c   : > { %4099 = vxpose.xlu1.b32.start [1/16] (narrow) %v3565_v4, 16  ;;  %v2142_v5 = vpop.trf.xlu1 }
 0x26d   : > { %2158 = vst [vmem:[%s5966_s29 + $0x28] sm:$0xff] %v2142_v5 }
 0x270   : > { %4100 = vxpose.xlu1.b32.cont [2/16] (narrow) %v5248_v63, 16 }
 0x271   : > { %v5259_v6 = vpop.f32.mrf.mxu1 }
 0x273   : > { %v3640_v7 = vpop.f32.mrf.mxu1 }
 0x274   : > { %4101 = vxpose.xlu1.b32.cont [3/16] (narrow) %v3640_v7, 16 }
 0x278   : > { %4102 = vxpose.xlu1.b32.cont [4/16] (narrow) %v5259_v6, 16 }
 0x279   : > { %v5270_v8 = vpop.f32.mrf.mxu1 }
 0x27b   : > { %v3715_v9 = vpop.f32.mrf.mxu1 }
 0x27c   : > { %4103 = vxpose.xlu1.b32.cont [5/16] (narrow) %v3715_v9, 16 }
 0x280   : > { %4104 = vxpose.xlu1.b32.cont [6/16] (narrow) %v5270_v8, 16 }
 0x281   : > { %v5281_v10 = vpop.f32.mrf.mxu1 }
 0x283   : > { %v3790_v11 = vpop.f32.mrf.mxu1 }
 0x284   : > { %4105 = vxpose.xlu1.b32.cont [7/16] (narrow) %v3790_v11, 16 }
 0x288   : > { %4106 = vxpose.xlu1.b32.cont [8/16] (narrow) %v5281_v10, 16 }
 0x289   : > { %v5292_v12 = vpop.f32.mrf.mxu1 }
 0x28b   : > { %v3865_v13 = vpop.f32.mrf.mxu1 }
 0x28c   : > { %4107 = vxpose.xlu1.b32.cont [9/16] (narrow) %v3865_v13, 16 }
 0x290   : > { %4108 = vxpose.xlu1.b32.cont [10/16] (narrow) %v5292_v12, 16 }
 0x291   : > { %v5303_v0 = vpop.f32.mrf.mxu1 }
 0x293   : > { %v3940_v14 = vpop.f32.mrf.mxu1 }
 0x294   : > { %4109 = vxpose.xlu1.b32.cont [11/16] (narrow) %v3940_v14, 16 }
 0x298   : > { %4110 = vxpose.xlu1.b32.cont [12/16] (narrow) %v5303_v0, 16 }
 0x299   : > { %v5314_v1 = vpop.f32.mrf.mxu1 }
 0x29b   : > { %v4015_v15 = vpop.f32.mrf.mxu1 }
 0x29c   : > { %4111 = vxpose.xlu1.b32.cont [13/16] (narrow) %v4015_v15, 16 }
 0x2a0   : > { %4112 = vxpose.xlu1.b32.cont [14/16] (narrow) %v5314_v1, 16 }
 0x2a1   : > { %v5325_v2 = vpop.f32.mrf.mxu1 }
 0x2a3   : > { %v4090_v16 = vpop.f32.mrf.mxu1 }
 0x2a4   : > { %4113 = vxpose.xlu1.b32.cont [15/16] (narrow) %v4090_v16, 16 }
 0x2a8   : > { %4114 = vxpose.xlu1.b32.end [16/16] (narrow) %v5325_v2, 16  ;;  %v3128_v3 = vpop.trf.xlu0 }
 0x2a9   : > { %3144 = vst [vmem:[%s5966_s29 + $0x10] sm:$0xff] %v3128_v3 }
 0x2ac   : > { %v3129_v17 = vpop.trf.xlu0 }
 0x2ad   : > { %3145 = vst [vmem:[%s5966_s29 + $0x30] sm:$0xff] %v3129_v17 }
 0x2e8   : > { %v4115_v18 = vpop.trf.xlu1 }
 0x2e9   : > { %4131 = vst [vmem:[%s5966_s29 + $0x18] sm:$0xff] %v4115_v18 }
 0x2ec   : > { %v4116_v19 = vpop.trf.xlu1 }
 0x2ed   : > { %4132 = vst [vmem:[%s5966_s29 + $0x38] sm:$0xff] %v4116_v19 }
 0x2ee   : > { %5383 = shalt.err (!%p5380_p3)
}
 0x2ef   : > { %s5384_s17 = scalar_lea.hbm %s5982_s7, 1024  ;;  %s5388_s24 = scalar_lea.hbm %s6030_s3, 2048 }
 0x2f0   : > { %p5385_p4 = scmp.ne.s32.totalorder %s5982_s7, %s5384_s17  ;;  %p5389_p9 = scmp.lt.s32.totalorder %s5982_s7, %s6030_s3 }
 0x2f1   : > { %p5390_p10 = scmp.lt.s32.totalorder %s5388_s24, %s5384_s17 }
 0x2f2   : > { %p5386_p7 = pnand %p5385_p4, %p5494_p5 }
 0x2f3   : > { %p5391_p11 = por %p5390_p10, %p5389_p9 }
 0x2f4   : > { %p5387_p8 = pneg %p5386_p7 }
 0x2f6   : > { %p5392_p12 = pnand %p5391_p11, %p5387_p8 }
 0x2f8   : > { %5395 = shalt.err (!%p5392_p12)
}
 0x2f9   : > { %s5433_s27 = smov 512   ;;  %s5434_s28 = smov 1024  }
 0x2fa   : > { %s5435_s29 = smov 32  }
 0x2fb   : > { %5326 = dma.vmem_to_hbm [thread:$0]  (%p5494_p5), %s5976_s30, 1024, %s5982_s7, %s5987_s8, %s5433_s27, %s5434_s28, %s5435_s29  }
 0x2fc PF: > { %p5332_p13 = scmp.ge.s32.totalorder %s5430_s15, 2  ;;  %s4162_s4 = sand.u32 1, %s5418_s12  }
 0x2fd   : > { %s4163_s5 = scalar_lea.sflag [#allocation3], %s4162_s4 }
 0x2fe   : > { %p5329_p0 = pnand %p5332_p13, %p5498_p6 }
 0x300   : > { %p5330_p1 = pneg %p5329_p0 }
 0x302   : > { %5413 = dma.done.wait (%p5330_p1), %s4163_s5, 1024  }
 0x303   : > { %5415 = vsyncadd (%p5330_p1), %s4163_s5, 4294966272  ;;  %p13_p2 = scmp.ge.s32.totalorder %s5481_s18, 4   ;;  %s6033_s12 = smov %s5422_s13 }
 0x304   : > { %s6034_s13 = smov %s5426_s14  ;;  %s6035_s14 = smov %s5492_s21 }
 0x305   : > { %s6036_s15 = smov %s5481_s18  ;;  %15 = sbr.rel (!%p13_p2) target bundleno = 3 (0x3), region = 67 }
 0x30a   :  { %4168 = vsyncpa [#allocation3], 1 }
 0x30b   :  { %4170 = vsyncpa [#allocation3 + $0x1], 1 }

</bundles_post_ra>
